<compile_context>
chip_gen: v7x
topology: tpu7x:2x2x1
jax: 0.10.0
libtpu: 0.0.40
codegen_flags: <defaults>
</compile_context>

<pallas_src>
import functools

import numpy as np
import jax
import jax.numpy as jnp
from jax import lax
from jax.experimental import pallas as pl
from jax.experimental.pallas import tpu as pltpu


_HEADER = 8   # zero rows above the first image (top SAME padding, 8-aligned)
_SEP = 8      # zero rows after every image (bottom pad + next image's top pad)
_KSIZE = 3    # 3x3 convs


# ----------------------------------------------------------------------------
# Fused forward kernel: conv1 -> conv2 -> conv3(+res) -> pool+flatten+linear
# ----------------------------------------------------------------------------
def _nas_forward_kernel(x_ref, w_ref, scale_ref, shift_ref, mask_ref,
                        wcls_ref, bcls_ref, o_ref, *, img_rows, block, header):
    """Single-invocation fused forward; every intermediate stays on chip.

    x_ref    : (R, L)      f32   batch-stacked input slab (see wrapper)
    w_ref    : (3, 3L, L)  bf16  banded conv weights, kh stacked along K
    scale_ref: (3, L)      f32   folded BatchNorm scale per layer (lane-tiled)
    shift_ref: (3, L)      f32   folded BatchNorm shift (+conv bias) per layer
    mask_ref : (R, 1)      f32   1.0 on image rows, 0.0 on padding/separators
    wcls_ref : (H*L, Kp)   bf16  avgpool+flatten+Linear folded weights
    bcls_ref : (1, Kp)     f32   Linear bias (classes lane-padded to Kp)
    o_ref    : (N, Kp)     f32   lane-padded logits
    """
    rows, lanes = x_ref.shape
    n_img = o_ref.shape[0]

    mask = mask_ref[...]                              # (R, 1) f32
    zero_row = jnp.zeros((1, lanes), jnp.float32)

    def conv_bn_relu(h, layer, shortcut=None, apply_mask=True):
        # 3x3 SAME conv over the whole batch-stacked slab as ONE MXU matmul:
        # lane-concatenate the three kh row-shifted views (K = 3L) and multiply
        # by the kh-stacked banded weights.  Zero separator rows supply the H
        # padding; the banded weights supply the W padding.
        up = jnp.concatenate([zero_row, h[:-1, :]], axis=0)    # row i <- h[i-1]
        down = jnp.concatenate([h[1:, :], zero_row], axis=0)   # row i <- h[i+1]
        lhs = jnp.concatenate([up, h, down], axis=1).astype(jnp.bfloat16)
        acc = jnp.dot(lhs, w_ref[layer], preferred_element_type=jnp.float32)
        out = acc * scale_ref[layer:layer + 1, :] + shift_ref[layer:layer + 1, :]
        if shortcut is not None:          # residual add before activation
            out = out + shortcut
        out = jnp.maximum(out, 0.0)       # ReLU; f32 epilogue (v5e: no bf16 VPU)
        if apply_mask:
            out = out * mask              # keep padding/separator rows exactly 0
        return out

    x = x_ref[...]
    h1 = conv_bn_relu(x, 0)                                     # node1
    h2 = conv_bn_relu(h1, 1)                                    # node2
    h3 = conv_bn_relu(h2, 2, shortcut=h1, apply_mask=False)     # node3 (+res)

    # node4 (avgpool 2x2/2) + node5 (torch NCHW flatten) + output nn.Linear are
    # folded into wcls at prep time; here we only flatten each image's rows
    # into lanes (lane concatenation) and run ONE lane-dense matmul per batch.
    flats = []
    for n in range(n_img):
        base = header + n * block                    # sublane-aligned offsets
        img = h3[base:base + img_rows, :]            # (img_rows, L) f32
        flats.append(jnp.concatenate(
            [img[r:r + 1, :] for r in range(img_rows)], axis=1))  # (1, H*L)
    head_lhs = jnp.concatenate(flats, axis=0).astype(jnp.bfloat16)  # (N, H*L)
    logits = jnp.dot(head_lhs, wcls_ref[...], preferred_element_type=jnp.float32)
    o_ref[...] = logits + bcls_ref[...]


# ----------------------------------------------------------------------------
# One-time parameter packing (PyTorch layouts -> kernel layouts)
# ----------------------------------------------------------------------------
def _pack_conv(w, b, gamma, beta, mean, var, *, width, k_lanes, eps=1e-5):
    """PyTorch conv2d(3x3, SAME) weight (Cout,Cin,3,3) + eval BatchNorm ->
    kh-stacked banded matmul weights (3*L, L) + folded per-lane affine.

    big[kh, wi*Cin+ci, wo*Cout+co] = w[co, ci, kh, kw] with wi = wo + kw - 1;
    out-of-range wi entries are zero, implementing the W-axis SAME padding.
    K is zero-padded up to k_lanes per kh block so all layers share (3L, L).
    """
    c_out, c_in, ksz, _ = w.shape
    wt = jnp.transpose(w, (2, 3, 1, 0)).astype(jnp.float32)        # (kh,kw,ci,co)
    wi = jnp.arange(width)[:, None, None]
    wo = jnp.arange(width)[None, :, None]
    kw = jnp.arange(ksz)[None, None, :]
    band = (wi == wo + kw - 1).astype(jnp.float32)                 # (W, W, kw)
    big = jnp.einsum("xyz,hzio->hxiyo", band, wt)                  # (kh,wi,ci,wo,co)
    big = big.reshape(ksz, width * c_in, width * c_out)
    big = jnp.pad(big, ((0, 0), (0, k_lanes - width * c_in), (0, 0)))
    stacked = big.reshape(ksz * k_lanes, width * c_out)            # kh stacked on K
    scale = gamma / jnp.sqrt(var + eps)
    shift = beta + scale * (b - mean)                              # conv bias folded
    return (stacked.astype(jnp.bfloat16),
            jnp.tile(scale, width).astype(jnp.float32),
            jnp.tile(shift, width).astype(jnp.float32))


def _pack_head(out_w, out_b, *, c, hp, wp, n_cls_pad=128):
    """Fold avgpool(2x2,/2) + torch NCHW flatten + nn.Linear into a single
    lane-padded matmul weight:
      wcls[h, w*c + ch, k] = 0.25 * out_w[k, ch*hp*wp + (h//2)*wp + w//2]
    flattened row-major over (h, lane) so logits = flat(h3) @ wcls_flat + bias.
    """
    n_cls = out_w.shape[0]
    w4 = 0.25 * jnp.transpose(out_w.reshape(n_cls, c, hp, wp).astype(jnp.float32),
                              (2, 3, 1, 0))                        # (hp, wp, c, k)
    w_rows = w4[jnp.arange(2 * hp) // 2]                           # expand pooled H
    w_rows = w_rows[:, jnp.arange(2 * wp) // 2]                    # expand pooled W
    hh, lanes = 2 * hp, 2 * wp * c
    wcls = w_rows.reshape(hh, lanes, n_cls)                        # lane = w*c + ch
    wcls = jnp.pad(wcls, ((0, 0), (0, 0), (0, n_cls_pad - n_cls)))  # lane-pad classes
    wcls_flat = wcls.reshape(hh * lanes, n_cls_pad)
    bias = jnp.pad(out_b.astype(jnp.float32), (0, n_cls_pad - n_cls))
    return wcls_flat.astype(jnp.bfloat16), bias.reshape(1, n_cls_pad)


def prepare_params(params, *, height=16, width=16, n_cls_pad=128):
    """One-time transform of PyTorch-layout parameters into kernel layout."""
    c_mid = params["node1"]["w"].shape[0]
    lanes = width * c_mid
    packed = [_pack_conv(**params[name], width=width, k_lanes=lanes)
              for name in ("node1", "node2", "node3")]
    wcls, bcls = _pack_head(params["out_w"], params["out_b"],
                            c=c_mid, hp=height // 2, wp=width // 2,
                            n_cls_pad=n_cls_pad)
    return dict(
        w=jnp.stack([p[0] for p in packed]),          # (3, 3L, L) bf16
        scales=jnp.stack([p[1] for p in packed]),     # (3, L) f32
        shifts=jnp.stack([p[2] for p in packed]),     # (3, L) f32
        wcls=wcls,                                    # (H*L, 128) bf16
        bcls=bcls,                                    # (1, 128) f32
    )


# ----------------------------------------------------------------------------
# NASTorchModel.forward (is_cls branch -> logits) for the instantiated graph
# ----------------------------------------------------------------------------
@functools.partial(jax.jit, static_argnames=("n_classes",))
def nas_model_forward(prep, x_nchw, *, n_classes):
    n, c_in, hh, ww = x_nchw.shape
    lanes = prep["scales"].shape[1]
    n_cls_pad = prep["bcls"].shape[1]
    block = hh + _SEP
    rows = _HEADER + n * block

    # NCHW (PyTorch) -> lane-dense (H, W*Cin) rows, zero-padded to L lanes.
    x_rows = jnp.transpose(x_nchw, (0, 2, 3, 1)).reshape(n, hh, ww * c_in)
    x_rows = jnp.pad(x_rows, ((0, 0), (0, 0), (0, lanes - ww * c_in)))
    # Batch-stack along the sublane axis: 8 zero header rows, then per image
    # [hh image rows | 8 zero rows].  Every SAME-padding row is zero and every
    # image block starts at a sublane-aligned offset.
    slab = jnp.pad(x_rows, ((0, 0), (0, block - hh), (0, 0))).reshape(n * block, lanes)
    slab = jnp.pad(slab, ((_HEADER, 0), (0, 0))).astype(jnp.float32)

    row_idx = np.arange(rows)
    mask = ((row_idx >= _HEADER) & (((row_idx - _HEADER) % block) < hh))
    mask = jnp.asarray(mask.astype(np.float32)).reshape(rows, 1)

    kernel = functools.partial(_nas_forward_kernel,
                               img_rows=hh, block=block, header=_HEADER)
    flops = 2 * 3 * rows * (3 * lanes) * lanes + 2 * n * (hh * lanes) * n_cls_pad
    bytes_accessed = (slab.size * 4 + prep["w"].size * 2 + prep["wcls"].size * 2
                      + prep["scales"].size * 4 + prep["shifts"].size * 4
                      + mask.size * 4 + prep["bcls"].size * 4 + n * n_cls_pad * 4)
    vmem_spec = pl.BlockSpec(memory_space=pltpu.MemorySpace.VMEM)

    logits_pad = pl.pallas_call(
        kernel,
        out_shape=jax.ShapeDtypeStruct((n, n_cls_pad), jnp.float32),
        in_specs=[vmem_spec] * 7,
        out_specs=vmem_spec,
        cost_estimate=pl.CostEstimate(flops=flops, transcendentals=0,
                                      bytes_accessed=bytes_accessed),
    )(slab, prep["w"], prep["scales"], prep["shifts"], mask,
      prep["wcls"], prep["bcls"])
    return logits_pad[:, :n_classes]


# ----------------------------------------------------------------------------
# Pure-JAX f32 reference of the same PyTorch forward (for a sanity check)
# ----------------------------------------------------------------------------
def _reference_forward(params, x, eps=1e-5):
    def conv_bn(p, h):
        y = lax.conv_general_dilated(h, p["w"], (1, 1), "SAME",
                                     dimension_numbers=("NCHW", "OIHW", "NCHW"))
        y = y + p["b"][None, :, None, None]
        scale = (p["gamma"] / jnp.sqrt(p["var"] + eps))[None, :, None, None]
        return (y - p["mean"][None, :, None, None]) * scale + p["beta"][None, :, None, None]

    h1 = jax.nn.relu(conv_bn(params["node1"], x))
    h2 = jax.nn.relu(conv_bn(params["node2"], h1))
    h3 = jax.nn.relu(conv_bn(params["node3"], h2) + h1)
    pooled = lax.reduce_window(h3, 0.0, lax.add,
                               (1, 1, 2, 2), (1, 1, 2, 2), "VALID") / 4.0
    flat = pooled.reshape(pooled.shape[0], -1)          # torch NCHW flatten order
    return flat @ params["out_w"].T + params["out_b"]


# ----------------------------------------------------------------------------
# Deterministic synthetic parameters in PyTorch layouts (fresh BN, eval mode)
# ----------------------------------------------------------------------------
def init_params(key, c_in=4, c_mid=8, hw=16, n_classes=10):
    ks = jax.random.split(key, 5)

    def conv_params(k, cin, cout):
        kw, kb = jax.random.split(k)
        fan_in = 9 * cin
        return dict(
            w=jax.random.normal(kw, (cout, cin, 3, 3), jnp.float32)
            / jnp.sqrt(fan_in),                                   # torch layout
            b=0.01 * jax.random.normal(kb, (cout,), jnp.float32),
            gamma=jnp.ones((cout,), jnp.float32),
            beta=jnp.zeros((cout,), jnp.float32),
            mean=jnp.zeros((cout,), jnp.float32),
            var=jnp.ones((cout,), jnp.float32),
        )

    flat_dim = c_mid * (hw // 2) * (hw // 2)
    return {
        "node1": conv_params(ks[0], c_in, c_mid),
        "node2": conv_params(ks[1], c_mid, c_mid),
        "node3": conv_params(ks[2], c_mid, c_mid),
        "out_w": jax.random.normal(ks[3], (n_classes, flat_dim), jnp.float32)
        / jnp.sqrt(flat_dim),                                     # torch Linear layout
        "out_b": 0.01 * jax.random.normal(ks[4], (n_classes,), jnp.float32),
    }


if __name__ == "__main__":
    key = jax.random.PRNGKey(0)
    kx, kp = jax.random.split(key)
    # batch=2, channels=4, spatial=16x16 (NCHW, as the PyTorch module expects)
    x = jax.random.normal(kx, (2, 4, 16, 16), jnp.float32)
    params = init_params(kp, c_in=4, c_mid=8, hw=16, n_classes=10)
    prep = prepare_params(params, height=16, width=16)

    logits = nas_model_forward(prep, x, n_classes=10)
    jax.block_until_ready(logits)
    assert logits.shape == (2, 10) and logits.dtype == jnp.float32
    assert bool(jnp.all(jnp.isfinite(logits)))

    # bf16 MXU inputs vs the f32 reference -> small numerical noise is expected;
    # a gross layout/packing bug would produce O(1) differences.
    ref = _reference_forward(params, x)
    err = float(jnp.max(jnp.abs(logits - ref)))
    assert err < 0.5, f"kernel vs reference mismatch: max abs diff {err:.3f}"
    print("KERNEL_OK")
</pallas_src>

<mosaic_0001>
module attributes {stable_mosaic.version = 11 : i64} {
  func.func @_nas_forward_kernel(%arg0: memref<56x128xf32, #tpu.memory_space<vmem>>, %arg1: memref<3x384x128xbf16, #tpu.memory_space<vmem>>, %arg2: memref<3x128xf32, #tpu.memory_space<vmem>>, %arg3: memref<3x128xf32, #tpu.memory_space<vmem>>, %arg4: memref<56x1xf32, #tpu.memory_space<vmem>>, %arg5: memref<2048x128xbf16, #tpu.memory_space<vmem>>, %arg6: memref<1x128xf32, #tpu.memory_space<vmem>>, %arg7: memref<2x128xf32, #tpu.memory_space<vmem>>) attributes {dimension_semantics = [], scalar_prefetch = 0 : i64, scratch_operands = 0 : i64, tpu.core_type = #tpu.core_type<tc>} {
    %c0 = arith.constant 0 : index
    %c0_0 = arith.constant 0 : index
    %0 = vector.load %arg4[%c0, %c0_0] : memref<56x1xf32, #tpu.memory_space<vmem>>, vector<56x1xf32>
    %cst = arith.constant 0.000000e+00 : f32
    %1 = vector.broadcast %cst : f32 to vector<1x128xf32>
    %c0_1 = arith.constant 0 : index
    %c0_2 = arith.constant 0 : index
    %2 = vector.load %arg0[%c0_1, %c0_2] : memref<56x128xf32, #tpu.memory_space<vmem>>, vector<56x128xf32>
    %3 = vector.extract_strided_slice %2 {offsets = [0, 0], sizes = [55, 128], strides = [1, 1]} : vector<56x128xf32> to vector<55x128xf32>
    %4 = tpu.concatenate %1, %3 in 0 : vector<1x128xf32>, vector<55x128xf32> -> vector<56x128xf32>
    %5 = vector.extract_strided_slice %2 {offsets = [1, 0], sizes = [55, 128], strides = [1, 1]} : vector<56x128xf32> to vector<55x128xf32>
    %6 = tpu.concatenate %5, %1 in 0 : vector<55x128xf32>, vector<1x128xf32> -> vector<56x128xf32>
    %7 = tpu.concatenate %4, %2, %6 in 1 : vector<56x128xf32>, vector<56x128xf32>, vector<56x128xf32> -> vector<56x384xf32>
    %8 = arith.truncf %7 : vector<56x384xf32> to vector<56x384xbf16>
    %c0_3 = arith.constant 0 : index
    %c0_4 = arith.constant 0 : index
    %c0_5 = arith.constant 0 : index
    %9 = vector.load %arg1[%c0_3, %c0_4, %c0_5] : memref<3x384x128xbf16, #tpu.memory_space<vmem>>, vector<1x384x128xbf16>
    %10 = vector.shape_cast %9 : vector<1x384x128xbf16> to vector<384x128xbf16>
    %cst_6 = arith.constant dense<0.000000e+00> : vector<56x128xf32>
    %11 = tpu.matmul %8, %10, %cst_6 {dimension_numbers = #tpu.dot_dimension_numbers<[1], [0], [0], [1], [0, 0, 1, 1], [], []>} : vector<56x384xbf16>, vector<384x128xbf16>, vector<56x128xf32> -> vector<56x128xf32>
    %c0_7 = arith.constant 0 : index
    %c0_8 = arith.constant 0 : index
    %12 = vector.load %arg2[%c0_7, %c0_8] : memref<3x128xf32, #tpu.memory_space<vmem>>, vector<1x128xf32>
    %13 = vector.broadcast %12 : vector<1x128xf32> to vector<56x128xf32>
    %14 = arith.mulf %11, %13 : vector<56x128xf32>
    %c0_9 = arith.constant 0 : index
    %c0_10 = arith.constant 0 : index
    %15 = vector.load %arg3[%c0_9, %c0_10] : memref<3x128xf32, #tpu.memory_space<vmem>>, vector<1x128xf32>
    %16 = vector.broadcast %15 : vector<1x128xf32> to vector<56x128xf32>
    %17 = arith.addf %14, %16 : vector<56x128xf32>
    %cst_11 = arith.constant 0.000000e+00 : f32
    %18 = vector.broadcast %cst_11 : f32 to vector<56x128xf32>
    %19 = arith.maximumf %17, %18 : vector<56x128xf32>
    %20 = vector.broadcast %0 : vector<56x1xf32> to vector<56x128xf32>
    %21 = arith.mulf %19, %20 : vector<56x128xf32>
    %22 = vector.extract_strided_slice %21 {offsets = [0, 0], sizes = [55, 128], strides = [1, 1]} : vector<56x128xf32> to vector<55x128xf32>
    %23 = tpu.concatenate %1, %22 in 0 : vector<1x128xf32>, vector<55x128xf32> -> vector<56x128xf32>
    %24 = vector.extract_strided_slice %21 {offsets = [1, 0], sizes = [55, 128], strides = [1, 1]} : vector<56x128xf32> to vector<55x128xf32>
    %25 = tpu.concatenate %24, %1 in 0 : vector<55x128xf32>, vector<1x128xf32> -> vector<56x128xf32>
    %26 = tpu.concatenate %23, %21, %25 in 1 : vector<56x128xf32>, vector<56x128xf32>, vector<56x128xf32> -> vector<56x384xf32>
    %27 = arith.truncf %26 : vector<56x384xf32> to vector<56x384xbf16>
    %c1 = arith.constant 1 : index
    %c0_12 = arith.constant 0 : index
    %c0_13 = arith.constant 0 : index
    %28 = vector.load %arg1[%c1, %c0_12, %c0_13] : memref<3x384x128xbf16, #tpu.memory_space<vmem>>, vector<1x384x128xbf16>
    %29 = vector.shape_cast %28 : vector<1x384x128xbf16> to vector<384x128xbf16>
    %cst_14 = arith.constant dense<0.000000e+00> : vector<56x128xf32>
    %30 = tpu.matmul %27, %29, %cst_14 {dimension_numbers = #tpu.dot_dimension_numbers<[1], [0], [0], [1], [0, 0, 1, 1], [], []>} : vector<56x384xbf16>, vector<384x128xbf16>, vector<56x128xf32> -> vector<56x128xf32>
    %c1_15 = arith.constant 1 : index
    %c0_16 = arith.constant 0 : index
    %31 = vector.load %arg2[%c1_15, %c0_16] : memref<3x128xf32, #tpu.memory_space<vmem>>, vector<1x128xf32>
    %32 = vector.broadcast %31 : vector<1x128xf32> to vector<56x128xf32>
    %33 = arith.mulf %30, %32 : vector<56x128xf32>
    %c1_17 = arith.constant 1 : index
    %c0_18 = arith.constant 0 : index
    %34 = vector.load %arg3[%c1_17, %c0_18] : memref<3x128xf32, #tpu.memory_space<vmem>>, vector<1x128xf32>
    %35 = vector.broadcast %34 : vector<1x128xf32> to vector<56x128xf32>
    %36 = arith.addf %33, %35 : vector<56x128xf32>
    %cst_19 = arith.constant 0.000000e+00 : f32
    %37 = vector.broadcast %cst_19 : f32 to vector<56x128xf32>
    %38 = arith.maximumf %36, %37 : vector<56x128xf32>
    %39 = vector.broadcast %0 : vector<56x1xf32> to vector<56x128xf32>
    %40 = arith.mulf %38, %39 : vector<56x128xf32>
    %41 = vector.extract_strided_slice %40 {offsets = [0, 0], sizes = [55, 128], strides = [1, 1]} : vector<56x128xf32> to vector<55x128xf32>
    %42 = tpu.concatenate %1, %41 in 0 : vector<1x128xf32>, vector<55x128xf32> -> vector<56x128xf32>
    %43 = vector.extract_strided_slice %40 {offsets = [1, 0], sizes = [55, 128], strides = [1, 1]} : vector<56x128xf32> to vector<55x128xf32>
    %44 = tpu.concatenate %43, %1 in 0 : vector<55x128xf32>, vector<1x128xf32> -> vector<56x128xf32>
    %45 = tpu.concatenate %42, %40, %44 in 1 : vector<56x128xf32>, vector<56x128xf32>, vector<56x128xf32> -> vector<56x384xf32>
    %46 = arith.truncf %45 : vector<56x384xf32> to vector<56x384xbf16>
    %c2 = arith.constant 2 : index
    %c0_20 = arith.constant 0 : index
    %c0_21 = arith.constant 0 : index
    %47 = vector.load %arg1[%c2, %c0_20, %c0_21] : memref<3x384x128xbf16, #tpu.memory_space<vmem>>, vector<1x384x128xbf16>
    %48 = vector.shape_cast %47 : vector<1x384x128xbf16> to vector<384x128xbf16>
    %cst_22 = arith.constant dense<0.000000e+00> : vector<56x128xf32>
    %49 = tpu.matmul %46, %48, %cst_22 {dimension_numbers = #tpu.dot_dimension_numbers<[1], [0], [0], [1], [0, 0, 1, 1], [], []>} : vector<56x384xbf16>, vector<384x128xbf16>, vector<56x128xf32> -> vector<56x128xf32>
    %c2_23 = arith.constant 2 : index
    %c0_24 = arith.constant 0 : index
    %50 = vector.load %arg2[%c2_23, %c0_24] : memref<3x128xf32, #tpu.memory_space<vmem>>, vector<1x128xf32>
    %51 = vector.broadcast %50 : vector<1x128xf32> to vector<56x128xf32>
    %52 = arith.mulf %49, %51 : vector<56x128xf32>
    %c2_25 = arith.constant 2 : index
    %c0_26 = arith.constant 0 : index
    %53 = vector.load %arg3[%c2_25, %c0_26] : memref<3x128xf32, #tpu.memory_space<vmem>>, vector<1x128xf32>
    %54 = vector.broadcast %53 : vector<1x128xf32> to vector<56x128xf32>
    %55 = arith.addf %52, %54 : vector<56x128xf32>
    %56 = arith.addf %55, %21 : vector<56x128xf32>
    %cst_27 = arith.constant 0.000000e+00 : f32
    %57 = vector.broadcast %cst_27 : f32 to vector<56x128xf32>
    %58 = arith.maximumf %56, %57 : vector<56x128xf32>
    %59 = vector.extract_strided_slice %58 {offsets = [8, 0], sizes = [16, 128], strides = [1, 1]} : vector<56x128xf32> to vector<16x128xf32>
    %60 = vector.extract_strided_slice %59 {offsets = [0, 0], sizes = [1, 128], strides = [1, 1]} : vector<16x128xf32> to vector<1x128xf32>
    %61 = vector.extract_strided_slice %59 {offsets = [1, 0], sizes = [1, 128], strides = [1, 1]} : vector<16x128xf32> to vector<1x128xf32>
    %62 = vector.extract_strided_slice %59 {offsets = [2, 0], sizes = [1, 128], strides = [1, 1]} : vector<16x128xf32> to vector<1x128xf32>
    %63 = vector.extract_strided_slice %59 {offsets = [3, 0], sizes = [1, 128], strides = [1, 1]} : vector<16x128xf32> to vector<1x128xf32>
    %64 = vector.extract_strided_slice %59 {offsets = [4, 0], sizes = [1, 128], strides = [1, 1]} : vector<16x128xf32> to vector<1x128xf32>
    %65 = vector.extract_strided_slice %59 {offsets = [5, 0], sizes = [1, 128], strides = [1, 1]} : vector<16x128xf32> to vector<1x128xf32>
    %66 = vector.extract_strided_slice %59 {offsets = [6, 0], sizes = [1, 128], strides = [1, 1]} : vector<16x128xf32> to vector<1x128xf32>
    %67 = vector.extract_strided_slice %59 {offsets = [7, 0], sizes = [1, 128], strides = [1, 1]} : vector<16x128xf32> to vector<1x128xf32>
    %68 = vector.extract_strided_slice %59 {offsets = [8, 0], sizes = [1, 128], strides = [1, 1]} : vector<16x128xf32> to vector<1x128xf32>
    %69 = vector.extract_strided_slice %59 {offsets = [9, 0], sizes = [1, 128], strides = [1, 1]} : vector<16x128xf32> to vector<1x128xf32>
    %70 = vector.extract_strided_slice %59 {offsets = [10, 0], sizes = [1, 128], strides = [1, 1]} : vector<16x128xf32> to vector<1x128xf32>
    %71 = vector.extract_strided_slice %59 {offsets = [11, 0], sizes = [1, 128], strides = [1, 1]} : vector<16x128xf32> to vector<1x128xf32>
    %72 = vector.extract_strided_slice %59 {offsets = [12, 0], sizes = [1, 128], strides = [1, 1]} : vector<16x128xf32> to vector<1x128xf32>
    %73 = vector.extract_strided_slice %59 {offsets = [13, 0], sizes = [1, 128], strides = [1, 1]} : vector<16x128xf32> to vector<1x128xf32>
    %74 = vector.extract_strided_slice %59 {offsets = [14, 0], sizes = [1, 128], strides = [1, 1]} : vector<16x128xf32> to vector<1x128xf32>
    %75 = vector.extract_strided_slice %59 {offsets = [15, 0], sizes = [1, 128], strides = [1, 1]} : vector<16x128xf32> to vector<1x128xf32>
    %76 = tpu.concatenate %60, %61, %62, %63, %64, %65, %66, %67, %68, %69, %70, %71, %72, %73, %74, %75 in 1 : vector<1x128xf32>, vector<1x128xf32>, vector<1x128xf32>, vector<1x128xf32>, vector<1x128xf32>, vector<1x128xf32>, vector<1x128xf32>, vector<1x128xf32>, vector<1x128xf32>, vector<1x128xf32>, vector<1x128xf32>, vector<1x128xf32>, vector<1x128xf32>, vector<1x128xf32>, vector<1x128xf32>, vector<1x128xf32> -> vector<1x2048xf32>
    %77 = vector.extract_strided_slice %58 {offsets = [32, 0], sizes = [16, 128], strides = [1, 1]} : vector<56x128xf32> to vector<16x128xf32>
    %78 = vector.extract_strided_slice %77 {offsets = [0, 0], sizes = [1, 128], strides = [1, 1]} : vector<16x128xf32> to vector<1x128xf32>
    %79 = vector.extract_strided_slice %77 {offsets = [1, 0], sizes = [1, 128], strides = [1, 1]} : vector<16x128xf32> to vector<1x128xf32>
    %80 = vector.extract_strided_slice %77 {offsets = [2, 0], sizes = [1, 128], strides = [1, 1]} : vector<16x128xf32> to vector<1x128xf32>
    %81 = vector.extract_strided_slice %77 {offsets = [3, 0], sizes = [1, 128], strides = [1, 1]} : vector<16x128xf32> to vector<1x128xf32>
    %82 = vector.extract_strided_slice %77 {offsets = [4, 0], sizes = [1, 128], strides = [1, 1]} : vector<16x128xf32> to vector<1x128xf32>
    %83 = vector.extract_strided_slice %77 {offsets = [5, 0], sizes = [1, 128], strides = [1, 1]} : vector<16x128xf32> to vector<1x128xf32>
    %84 = vector.extract_strided_slice %77 {offsets = [6, 0], sizes = [1, 128], strides = [1, 1]} : vector<16x128xf32> to vector<1x128xf32>
    %85 = vector.extract_strided_slice %77 {offsets = [7, 0], sizes = [1, 128], strides = [1, 1]} : vector<16x128xf32> to vector<1x128xf32>
    %86 = vector.extract_strided_slice %77 {offsets = [8, 0], sizes = [1, 128], strides = [1, 1]} : vector<16x128xf32> to vector<1x128xf32>
    %87 = vector.extract_strided_slice %77 {offsets = [9, 0], sizes = [1, 128], strides = [1, 1]} : vector<16x128xf32> to vector<1x128xf32>
    %88 = vector.extract_strided_slice %77 {offsets = [10, 0], sizes = [1, 128], strides = [1, 1]} : vector<16x128xf32> to vector<1x128xf32>
    %89 = vector.extract_strided_slice %77 {offsets = [11, 0], sizes = [1, 128], strides = [1, 1]} : vector<16x128xf32> to vector<1x128xf32>
    %90 = vector.extract_strided_slice %77 {offsets = [12, 0], sizes = [1, 128], strides = [1, 1]} : vector<16x128xf32> to vector<1x128xf32>
    %91 = vector.extract_strided_slice %77 {offsets = [13, 0], sizes = [1, 128], strides = [1, 1]} : vector<16x128xf32> to vector<1x128xf32>
    %92 = vector.extract_strided_slice %77 {offsets = [14, 0], sizes = [1, 128], strides = [1, 1]} : vector<16x128xf32> to vector<1x128xf32>
    %93 = vector.extract_strided_slice %77 {offsets = [15, 0], sizes = [1, 128], strides = [1, 1]} : vector<16x128xf32> to vector<1x128xf32>
    %94 = tpu.concatenate %78, %79, %80, %81, %82, %83, %84, %85, %86, %87, %88, %89, %90, %91, %92, %93 in 1 : vector<1x128xf32>, vector<1x128xf32>, vector<1x128xf32>, vector<1x128xf32>, vector<1x128xf32>, vector<1x128xf32>, vector<1x128xf32>, vector<1x128xf32>, vector<1x128xf32>, vector<1x128xf32>, vector<1x128xf32>, vector<1x128xf32>, vector<1x128xf32>, vector<1x128xf32>, vector<1x128xf32>, vector<1x128xf32> -> vector<1x2048xf32>
    %95 = tpu.concatenate %76, %94 in 0 : vector<1x2048xf32>, vector<1x2048xf32> -> vector<2x2048xf32>
    %96 = arith.truncf %95 : vector<2x2048xf32> to vector<2x2048xbf16>
    %c0_28 = arith.constant 0 : index
    %c0_29 = arith.constant 0 : index
    %97 = vector.load %arg5[%c0_28, %c0_29] : memref<2048x128xbf16, #tpu.memory_space<vmem>>, vector<2048x128xbf16>
    %cst_30 = arith.constant dense<0.000000e+00> : vector<2x128xf32>
    %98 = tpu.matmul %96, %97, %cst_30 {dimension_numbers = #tpu.dot_dimension_numbers<[1], [0], [0], [1], [0, 0, 1, 1], [], []>} : vector<2x2048xbf16>, vector<2048x128xbf16>, vector<2x128xf32> -> vector<2x128xf32>
    %c0_31 = arith.constant 0 : index
    %c0_32 = arith.constant 0 : index
    %99 = vector.load %arg6[%c0_31, %c0_32] : memref<1x128xf32, #tpu.memory_space<vmem>>, vector<1x128xf32>
    %100 = vector.broadcast %99 : vector<1x128xf32> to vector<2x128xf32>
    %101 = arith.addf %98, %100 : vector<2x128xf32>
    %c0_33 = arith.constant 0 : index
    %c0_34 = arith.constant 0 : index
    %102 = vector.load %arg7[%c0_33, %c0_34] : memref<2x128xf32, #tpu.memory_space<vmem>>, vector<2x128xf32>
    tpu.vector_store %arg7[%c0_33, %c0_34], %101 {strides = array<i32>} : memref<2x128xf32, #tpu.memory_space<vmem>>, vector<2x128xf32>,
    return
  }
}

</mosaic_0001>

<bundles_post_ra>
// kernel: nas_model_forward.1
= control target key start
LH: loop header
LB: loop body
LE: loop exit
PB: predicated region body
PF: predicated region fallthrough
CT: control target
= control target key end

     0   :  { %12 = vsyncpa [#allocation3], 0  ;;  %s4544_s0 = inlined_call_operand.vmem [shape: f32[56,128], index: 0, kind: input, shape index: {}]   ;;  %s4545_s1 = inlined_call_operand.vmem [shape: bf16[3,384,128], index: 1, kind: input, shape index: {}]   ;;  %s4546_s2 = inlined_call_operand.hbm [shape: f32[3,128], index: 2, kind: input, shape index: {}]   ;;  %s4547_s3 = inlined_call_operand.hbm [shape: f32[3,128], index: 3, kind: input, shape index: {}]   ;;  %s4548_s4 = inlined_call_operand.vmem [shape: f32[56,1], index: 4, kind: input, shape index: {}]   ;;  %s4549_s5 = inlined_call_operand.hbm [shape: bf16[2048,128], index: 5, kind: input, shape index: {}]   ;;  %s4550_s6 = inlined_call_operand.hbm [shape: f32[1,128], index: 6, kind: input, shape index: {}]   ;;  %s4551_s7 = inlined_call_operand.hbm [shape: f32[2,128], index: 7, kind: output, shape index: {}]  }
   0x1   :  { %13 = vsyncpa [#allocation6], 0 }
   0x2   :  { %14 = vsyncpa [#allocation9], 0 }
   0x3   :  { %15 = vsyncpa [#allocation4], 0  ;;  %s3915_s24 = smov [#allocation5]   ;;  %s3916_s26 = smov [#allocation2]  }
   0x4   :  { %s36_s25 = sshll.u32 %s3915_s24, 4  ;;  %s26_s27 = sshll.u32 %s3916_s26, 4  ;;  %s37_s25 = int_to_ptr.vmem [resolvable:$true] %s36_s25  ;;  %s27_s27 = int_to_ptr.vmem [resolvable:$true] %s26_s27 }
   0x5   :  { %s3797_s30 = scalar_lea.hbm %s4547_s3, 64 }
   0x6   :  { %p3798_p0 = scmp.ne.s32.totalorder %s4547_s3, %s3797_s30  ;;  %p3801_p1 = scmp.lt.u32.totalorder %s3797_s30, %s4547_s3 }
   0x8   :  { %p3803_p2 = pnand %p3801_p1, %p3798_p0 }
   0xa   :  { %3806 = shalt.err (!%p3803_p2)
}
   0xb   :  { %s3807_s12 = scalar_lea.vmem %s37_s25, 64  ;;  %p3812_p4 = scmp.lt.s32.totalorder %s37_s25, %s37_s25 }
   0xc   :  { %p3808_p3 = scmp.ne.s32.totalorder %s37_s25, %s3807_s12  ;;  %p3813_p5 = scmp.lt.s32.totalorder %s3807_s12, %s3807_s12 }
   0xe   :  { %p3814_p6 = por %p3813_p5, %p3812_p4 }
  0x10   :  { %p3815_p7 = pnand %p3814_p6, %p3808_p3 }
  0x12   :  { %3818 = shalt.err (!%p3815_p7)
}
  0x13   :  { %39 = dma.hbm_to_vmem [thread:$0]  %s4547_s3, 64, %s37_s25, [#allocation6]  }
  0x14   :  { %s3819_s17 = scalar_lea.hbm %s4546_s2, 64 }
  0x15   :  { %p3820_p8 = scmp.ne.s32.totalorder %s4546_s2, %s3819_s17  ;;  %p3823_p9 = scmp.lt.u32.totalorder %s3819_s17, %s4546_s2 }
  0x17   :  { %p3825_p10 = pnand %p3823_p9, %p3820_p8 }
  0x19   :  { %3828 = shalt.err (!%p3825_p10)
}
  0x1a   :  { %s3829_s22 = scalar_lea.vmem %s27_s27, 64  ;;  %p3834_p12 = scmp.lt.s32.totalorder %s27_s27, %s27_s27 }
  0x1b   :  { %p3830_p11 = scmp.ne.s32.totalorder %s27_s27, %s3829_s22  ;;  %p3835_p13 = scmp.lt.s32.totalorder %s3829_s22, %s3829_s22 }
  0x1d   :  { %p3836_p0 = por %p3835_p13, %p3834_p12 }
  0x1f   :  { %p3837_p1 = pnand %p3836_p0, %p3830_p11 }
  0x21   :  { %3840 = shalt.err (!%p3837_p1)
}
  0x22   :  { %29 = dma.hbm_to_vmem [thread:$0]  %s4546_s2, 64, %s27_s27, [#allocation3]  }
  0x23   :  { %s3917_s24 = smov [#allocation7]   ;;  %s3841_s29 = scalar_lea.hbm %s4549_s5, 16384 }
  0x24   :  { %s47_s25 = sshll.u32 %s3917_s24, 4  ;;  %p3842_p2 = scmp.ne.s32.totalorder %s4549_s5, %s3841_s29  ;;  %s48_s25 = int_to_ptr.vmem [resolvable:$true] %s47_s25 }
  0x25   :  { %p3845_p3 = scmp.lt.u32.totalorder %s3841_s29, %s4549_s5 }
  0x27   :  { %p3847_p4 = pnand %p3845_p3, %p3842_p2 }
  0x29   :  { %3850 = shalt.err (!%p3847_p4)
}
  0x2a   :  { %s3851_s11 = scalar_lea.vmem %s48_s25, 16384  ;;  %p3856_p6 = scmp.lt.s32.totalorder %s48_s25, %s48_s25 }
  0x2b   :  { %p3852_p5 = scmp.ne.s32.totalorder %s48_s25, %s3851_s11  ;;  %p3857_p7 = scmp.lt.s32.totalorder %s3851_s11, %s3851_s11 }
  0x2d   :  { %p3858_p8 = por %p3857_p7, %p3856_p6 }
  0x2f   :  { %p3859_p9 = pnand %p3858_p8, %p3852_p5 }
  0x31   :  { %3862 = shalt.err (!%p3859_p9)
}
  0x32   :  { %s3918_s2 = smov 64   ;;  %s3919_s27 = smov 4  }
  0x33   :  { %53 = dma.hbm_to_vmem [thread:$0]  %s4549_s5, 16384, %s48_s25, [#allocation6], %s3918_s2, %s3918_s2, %s3919_s27  }
  0x34   :  { %s3920_s14 = smov [#allocation8]   ;;  %s3863_s18 = scalar_lea.hbm %s4550_s6, 16 }
  0x35   :  { %s60_s15 = sshll.u32 %s3920_s14, 4  ;;  %p3864_p10 = scmp.ne.s32.totalorder %s4550_s6, %s3863_s18  ;;  %s61_s15 = int_to_ptr.vmem [resolvable:$true] %s60_s15 }
  0x36   :  { %p3867_p11 = scmp.lt.u32.totalorder %s3863_s18, %s4550_s6 }
  0x38   :  { %p3869_p12 = pnand %p3867_p11, %p3864_p10 }
  0x3a   :  { %3872 = shalt.err (!%p3869_p12)
}
  0x3b   :  { %s3873_s3 = scalar_lea.vmem %s61_s15, 16  ;;  %s3877_s5 = scalar_lea.vmem %s61_s15, 32 }
  0x3c   :  { %p3874_p13 = scmp.ne.s32.totalorder %s61_s15, %s3873_s3  ;;  %p3878_p0 = scmp.lt.s32.totalorder %s61_s15, %s61_s15 }
  0x3d   :  { %p3879_p1 = scmp.lt.s32.totalorder %s3877_s5, %s3873_s3 }
  0x3f   :  { %p3880_p2 = por %p3879_p1, %p3878_p0 }
  0x41   :  { %p3881_p3 = pnand %p3880_p2, %p3874_p13 }
  0x43   :  { %3884 = shalt.err (!%p3881_p3)
}
  0x44   :  { %63 = dma.hbm_to_vmem [thread:$0]  %s4550_s6, 16, %s61_s15, [#allocation9]  }
  0x45   :  { %3907 = dma.done.wait [#allocation3], 64  }
  0x46   :  { %3908 = vsyncadd [#allocation3], 4294967232 }
  0x47   :  { %3909 = dma.done.wait [#allocation6], 16448  }
  0x48   :  { %3910 = vsyncadd [#allocation6], 4294950848 }
  0x49   :  { %3911 = dma.done.wait [#allocation9], 16  }
  0x4a   :  { %3912 = vsyncadd [#allocation9], 4294967280  ;;  %v3921_v0 = vmov 0   ;;  %v3597_v1 = vld [vmem:[%s4545_s1 + $0x40] sm:$0xff]   ;;  %v3600_v4 = vld [vmem:[%s4545_s1 + $0x48] sm:$0xff]   ;;  %vm98_vm0 = vcmask 1040384  }
  0x4b   :  { %3595 = vset.pattern.permute.xlu0 %v3921_v0  ;;  %3596 = vset.pattern.permute.xlu1 %v3921_v0  ;;  %v3598_v2 = vld [vmem:[%s4545_s1] sm:$0xff]   ;;  %v3601_v5 = vld [vmem:[%s4545_s1 + $0x8] sm:$0xff]   ;;  %v3603_v7 = vld [vmem:[%s4545_s1 + $0x50] sm:$0xff]   ;;  %vm120_vm1 = vcmask 1046528   ;;  %vm3922_vm3 = vmmov 1  }
  0x4c   :  { %3182 = vmatprep.subr.bf16.mxu0 %v3597_v1  ;;  %v3599_v3 = vld [vmem:[%s4545_s1 + $0x80] sm:$0xff]   ;;  %v3602_v6 = vld [vmem:[%s4545_s1 + $0x88] sm:$0xff]   ;;  %v3604_v8 = vld [vmem:[%s4545_s1 + $0x10] sm:$0xff]  }
  0x4d   :  { %3183 = vmatpush3.bf16.msra.mxu0 %v3598_v2  ;;  %3514 = vmatprep.subr.bf16.mxu1 %v3599_v3  ;;  %v3605_v9 = vld [vmem:[%s4545_s1 + $0x90] sm:$0xff]   ;;  %v3606_v10 = vld [vmem:[%s4545_s1 + $0x58] sm:$0xff]   ;;  %v3609_v13 = vld [vmem:[%s4545_s1 + $0x60] sm:$0xff]  }
  0x4e   :  { %3515 = vmatpush3.bf16.msra.mxu1 %v3599_v3  ;;  %3184 = vmatprep.subr.bf16.mxu0 %v3600_v4  ;;  %v3607_v11 = vld [vmem:[%s4545_s1 + $0x18] sm:$0xff]   ;;  %v3611_v14 = vld [vmem:[%s4545_s1 + $0xa0] sm:$0xff]   ;;  %v3612_v16 = vld [vmem:[%s4545_s1 + $0x68] sm:$0xff]  }
  0x4f   :  { %3516 = vmatprep.subr.bf16.mxu1 %v3602_v6  ;;  %v3608_v12 = vld [vmem:[%s4545_s1 + $0x98] sm:$0xff]   ;;  %v3610_v15 = vld [vmem:[%s4545_s1 + $0x20] sm:$0xff]   ;;  %v3614_v17 = vld [vmem:[%s4545_s1 + $0xa8] sm:$0xff]  }
  0x50   :  { %v3613_v18 = vld [vmem:[%s4545_s1 + $0x28] sm:$0xff]   ;;  %v3615_v19 = vld [vmem:[%s4545_s1 + $0x70] sm:$0xff]   ;;  %v3618_v22 = vld [vmem:[%s4545_s1 + $0x78] sm:$0xff]  }
  0x51   :  { %3185 = vmatpush3.bf16.msra.mxu0 %v3601_v5  ;;  %v3616_v20 = vld [vmem:[%s4545_s1 + $0x30] sm:$0xff]   ;;  %v84_v23 = vld [vmem:[%s4544_s0] sm:$0xff]  ;;  %v4084_v24 = vld [vmem:[%s4544_s0 + $0x8] sm:$0xff] }
  0x52   :  { %3186 = vmatprep.subr.bf16.mxu0 %v3603_v7  ;;  %3517 = vmatpush3.bf16.msra.mxu1 %v3602_v6  ;;  %v3617_v21 = vld [vmem:[%s4545_s1 + $0xb0] sm:$0xff]   ;;  %v99_v26 = vrot.slane %v84_v23, 7  ;;  %v100_v27 = vrot.slane %v4084_v24, 7  ;;  %v121_v28 = vrot.slane %v84_v23, 1  ;;  %v122_v29 = vrot.slane %v4084_v24, 1  ;;  %vm4094_vm2 = vmneg %vm98_vm0  ;;  %v4101_v31 = vld [vmem:[%s4544_s0 + $0x18] sm:$0xff] }
  0x53   :  { %3518 = vmatprep.subr.bf16.mxu1 %v3605_v9  ;;  %v4089_v25 = vld [vmem:[%s4544_s0 + $0x10] sm:$0xff]  ;;  %v4106_v32 = vld [vmem:[%s4544_s0 + $0x20] sm:$0xff]  ;;  %v3620_v33 = vld [vmem:[%s4545_s1 + $0xb8] sm:$0xff]   ;;  %v143_v34 = vpack.c.bf16 %v4084_v24, %v84_v23  ;;  %v126_v36 = vrot.slane %v4101_v31, 1  ;;  %v104_v58 = vrot.slane %v4101_v31, 7 }
  0x54   :  { %v124_v35 = vrot.slane %v4089_v25, 1  ;;  %v128_v37 = vrot.slane %v4106_v32, 1  ;;  %v4118_v38 = vld [vmem:[%s4544_s0 + $0x28] sm:$0xff]  ;;  %v77_v39 = vld [vmem:[%s4548_s4] sm:$0xff]  ;;  %v3619_v40 = vld [vmem:[%s4545_s1 + $0x38] sm:$0xff]   ;;  %v101_v41 = vsel %vm98_vm0, %v99_v26, %v100_v27  ;;  %v123_v42 = vsel %vm120_vm1, %v121_v28, %v122_v29 }
  0x55   :  { %3187 = vmatpush3.bf16.msra.mxu0 %v3604_v8  ;;  %v4131_v43 = vld [vmem:[%s4544_s0 + $0x30] sm:$0xff]  ;;  %507 = vperm.xlu0 %3595, %v77_v39   ;;  %vm4138_vm4 = vmpackc.low %vm3922_vm3, %vm4094_vm2  ;;  %v102_v47 = vrot.slane %v4089_v25, 7  ;;  %v78_v48 = vld [vmem:[%s4548_s4 + $0x8] sm:$0xff]  ;;  %v130_v52 = vrot.slane %v4118_v38, 1  ;;  %v2872_v54 = vpack.c.bf16 %v101_v41, %v99_v26  ;;  %v146_v57 = vpack.c.bf16 %v4101_v31, %v4089_v25 }
  0x56   :  { %3188 = vmatprep.subr.bf16.mxu0 %v3606_v10  ;;  %3519 = vmatpush3.bf16.msra.mxu1 %v3605_v9  ;;  %v79_v44 = vld [vmem:[%s4548_s4 + $0x10] sm:$0xff]  ;;  %v125_v46 = vsel %vm120_vm1, %v122_v29, %v124_v35  ;;  %v127_v50 = vsel %vm120_vm1, %v124_v35, %v126_v36  ;;  %v129_v51 = vsel %vm120_vm1, %v126_v36, %v128_v37  ;;  %v3621_v53 = vld [vmem:[%s4545_s1 + $0x100] sm:$0xff]   ;;  %v132_v55 = vrot.slane %v4131_v43, 1  ;;  %v80_v56 = vld [vmem:[%s4548_s4 + $0x18] sm:$0xff] }
  0x57   :  { %3520 = vmatprep.subr.bf16.mxu1 %v3608_v12  ;;  %378 = vmatprep.mubr.bf16.mxu0 %v143_v34  ;;  %v144_v49 = vpack.c.bf16 %v125_v46, %v123_v42  ;;  %v131_v59 = vsel %vm120_vm1, %v128_v37, %v130_v52  ;;  %v81_v60 = vld [vmem:[%s4548_s4 + $0x20] sm:$0xff]  ;;  %v147_v62 = vpack.c.bf16 %v129_v51, %v127_v50  ;;  %v82_v0 = vld [vmem:[%s4548_s4 + $0x28] sm:$0xff]  ;;  %vm4173_vm5 = vmpackc.low %vm120_vm1, %vm120_vm1  ;;  %v106_v3 = vrot.slane %v4106_v32, 7 }
  0x58   :  { %517 = vperm.xlu1 %3596, %v79_v44   ;;  %v3622_v61 = vld [vmem:[%s4545_s1 + $0xc0] sm:$0xff]   ;;  %v133_v63 = vsel %vm120_vm1, %v130_v52, %v132_v55  ;;  %v3623_v4 = vld [vmem:[%s4545_s1 + $0x108] sm:$0xff]   ;;  %v108_v5 = vrot.slane %v4118_v38, 7  ;;  %v103_v7 = vsel %vm98_vm0, %v100_v27, %v102_v47  ;;  %v105_v8 = vsel %vm98_vm0, %v102_v47, %v104_v58  ;;  %v83_v10 = vld [vmem:[%s4548_s4 + $0x30] sm:$0xff] }
  0x59   :  { %3189 = vmatpush3.bf16.msra.mxu0 %v3607_v11  ;;  %3530 = vmatprep.mubr.bf16.mxu1 %v144_v49  ;;  %v150_v1 = vpack.c.bf16 %v133_v63, %v131_v59  ;;  %v3624_v6 = vld [vmem:[%s4545_s1 + $0xc8] sm:$0xff]   ;;  %v110_v9 = vrot.slane %v4131_v43, 7  ;;  %v3625_v11 = vld [vmem:[%s4545_s1 + $0x110] sm:$0xff]   ;;  %v3628_v23 = vld [vmem:[%s4545_s1 + $0xd8] sm:$0xff]  }
  0x5a   :  { %3190 = vmatprep.subr.bf16.mxu0 %v3609_v13  ;;  %3521 = vmatpush3.bf16.msra.mxu1 %v3608_v12  ;;  %v3626_v12 = vld [vmem:[%s4545_s1 + $0xd0] sm:$0xff]   ;;  %v145_v13 = vpack.c.bf16 %v105_v8, %v103_v7  ;;  %v3629_v24 = vld [vmem:[%s4545_s1 + $0x140] sm:$0xff]   ;;  %v3632_v27 = vld [vmem:[%s4545_s1 + $0x148] sm:$0xff]  }
  0x5b   :  { %3522 = vmatprep.subr.bf16.mxu1 %v3611_v14  ;;  %512 = vperm.xlu0 %3595, %v78_v48   ;;  %v3630_v25 = vld [vmem:[%s4545_s1 + $0x120] sm:$0xff]   ;;  %v3633_v28 = vld [vmem:[%s4545_s1 + $0x128] sm:$0xff]   ;;  %v3635_v30 = vld [vmem:[%s4545_s1 + $0x150] sm:$0xff]  }
  0x5c   :  { %522 = vperm.xlu1 %3596, %v80_v56   ;;  %v3631_v26 = vld [vmem:[%s4545_s1 + $0xe0] sm:$0xff]   ;;  %v3634_v29 = vld [vmem:[%s4545_s1 + $0xe8] sm:$0xff]   ;;  %v3636_v31 = vld [vmem:[%s4545_s1 + $0x130] sm:$0xff]  }
  0x5d   :  { %3191 = vmatpush3.bf16.msra.mxu0 %v3610_v15  ;;  %v2875_v15 = vpack.c.bf16 %v132_v55, %v132_v55  ;;  %v3639_v34 = vld [vmem:[%s4545_s1 + $0x138] sm:$0xff]   ;;  %v3641_v36 = vld [vmem:[%s4545_s1 + $0x160] sm:$0xff]   ;;  %v3642_v37 = vld [vmem:[%s4545_s1 + $0x168] sm:$0xff]  }
  0x5e   :  { %3192 = vmatprep.subr.bf16.mxu0 %v3612_v16  ;;  %3523 = vmatpush3.bf16.msra.mxu1 %v3611_v14  ;;  %v149_v14 = vpack.c.bf16 %v4118_v38, %v4106_v32  ;;  %v107_v16 = vsel %vm98_vm0, %v104_v58, %v106_v3  ;;  %v3637_v32 = vld [vmem:[%s4545_s1 + $0xf0] sm:$0xff]   ;;  %v3640_v35 = vld [vmem:[%s4545_s1 + $0xf8] sm:$0xff]   ;;  %v4262_v48 = vld [vmem:[#allocation2] ss:$0 sm:$0xff] }
  0x5f   :  { %3524 = vmatprep.subr.bf16.mxu1 %v3614_v17  ;;  %527 = vperm.xlu0 %3595, %v81_v60   ;;  %v3643_v38 = vld [vmem:[%s4545_s1 + $0x170] sm:$0xff]   ;;  %v3644_v39 = vld [vmem:[%s4545_s1 + $0x178] sm:$0xff]   ;;  %v4264_v52 = vld [vmem:[#allocation5] ss:$0 sm:$0xff] }
  0x60   :  { %532 = vperm.xlu1 %3596, %v82_v0   ;;  %v3677_v2 = vld [vmem:[#allocation7 + $0x50] sm:$0xff]  }
  0x61   :  { %3193 = vmatpush3.bf16.msra.mxu0 %v3613_v18 }
  0x62   :  { %3194 = vmatprep.subr.bf16.mxu0 %v3615_v19  ;;  %3525 = vmatpush3.bf16.msra.mxu1 %v3614_v17  ;;  %v109_v17 = vsel %vm98_vm0, %v106_v3, %v108_v5  ;;  %v152_v19 = vpack.c.bf16 %v4131_v43, %v4131_v43 }
  0x63   :  { %3526 = vmatprep.subr.bf16.mxu1 %v3617_v21  ;;  %537 = vperm.xlu0 %3595, %v83_v10   ;;  %v148_v18 = vpack.c.bf16 %v109_v17, %v107_v16 }
  0x65   :  { %3195 = vmatpush3.bf16.msra.mxu0 %v3616_v20  ;;  %v111_v20 = vsel %vm98_vm0, %v108_v5, %v110_v9 }
  0x66   :  { %3196 = vmatprep.subr.bf16.mxu0 %v3618_v22  ;;  %3527 = vmatpush3.bf16.msra.mxu1 %v3617_v21  ;;  %v151_v21 = vpack.c.bf16 %v111_v20, %v111_v20  ;;  %v3627_v22 = vld [vmem:[%s4545_s1 + $0x118] sm:$0xff]  }
  0x67   :  { %3528 = vmatprep.subr.bf16.mxu1 %v3620_v33 }
  0x69   :  { %3197 = vmatpush3.bf16.msra.mxu0 %v3619_v40 }
  0x6a   :  { %3234 = vmatprep.subr.bf16.mxu0 %v3621_v53  ;;  %3529 = vmatpush3.bf16.msra.mxu1 %v3620_v33  ;;  %v3638_v33 = vld [vmem:[%s4545_s1 + $0x158] sm:$0xff]  }
  0x6b   :  { %3538 = vmatprep.subr.bf16.mxu1 %v3629_v24 }
  0x6c   :  { %2873 = vmatmul.mubr.msk.bf16.vlgmr.msra.gmra.mrb[0].mxu0 %vm4138_vm4, %v2872_v54 }
  0x6d   :  { %386 = vmatprep.mubr.bf16.mxu0 %v146_v57  ;;  %3235 = vmatpush3.bf16.msra.mxu0 %v3622_v61 }
  0x6e   :  { %3531 = vmatmul.mubr.bf16.vlgmr.msra.gmra.mrb[0].mxu1 %v147_v62  ;;  %3236 = vmatprep.subr.bf16.mxu0 %v3623_v4 }
  0x6f   :  { %3534 = vmatprep.mubr.bf16.mxu1 %v150_v1  ;;  %3539 = vmatpush3.bf16.msra.mxu1 %v3629_v24 }
  0x70   :  { %3540 = vmatprep.subr.bf16.mxu1 %v3632_v27 }
  0x71   :  { %3237 = vmatpush3.bf16.msra.mxu0 %v3624_v6 }
  0x72   :  { %3238 = vmatprep.subr.bf16.mxu0 %v3625_v11 }
  0x73   :  { %3541 = vmatpush3.bf16.msra.mxu1 %v3632_v27 }
  0x74   :  { %387 = vmatmul.mubr.bf16.gmra.mrb[4].mxu0 %v145_v13  ;;  %3542 = vmatprep.subr.bf16.mxu1 %v3635_v30 }
  0x75   :  { %394 = vmatprep.mubr.bf16.mxu0 %v149_v14  ;;  %3239 = vmatpush3.bf16.msra.mxu0 %v3626_v12 }
  0x76   :  { %3535 = vmatmul.mubr.msk.bf16.gmra.mrb[4].mxu1 %vm4173_vm5, %v2875_v15  ;;  %3240 = vmatprep.subr.bf16.mxu0 %v3627_v22 }
  0x77   :  { %3543 = vmatpush3.bf16.msra.mxu1 %v3635_v30 }
  0x78   :  { %3544 = vmatprep.subr.bf16.mxu1 %v3638_v33 }
  0x79   :  { %3241 = vmatpush3.bf16.msra.mxu0 %v3628_v23 }
  0x7a   :  { %3242 = vmatprep.subr.bf16.mxu0 %v3630_v25 }
  0x7b   :  { %3545 = vmatpush3.bf16.msra.mxu1 %v3638_v33 }
  0x7c   :  { %395 = vmatmul.mubr.bf16.gmra.mrb[8].mxu0 %v148_v18  ;;  %3546 = vmatprep.subr.bf16.mxu1 %v3641_v36 }
  0x7d   :  { %402 = vmatprep.mubr.bf16.mxu0 %v152_v19  ;;  %3243 = vmatpush3.bf16.msra.mxu0 %v3631_v26 }
  0x7e   :  { %3244 = vmatprep.subr.bf16.mxu0 %v3633_v28 }
  0x7f   :  { %3547 = vmatpush3.bf16.msra.mxu1 %v3641_v36 }
  0x80   :  { %3548 = vmatprep.subr.bf16.mxu1 %v3642_v37 }
  0x81   :  { %3245 = vmatpush3.bf16.msra.mxu0 %v3634_v29 }
  0x82   :  { %3246 = vmatprep.subr.bf16.mxu0 %v3636_v31 }
  0x83   :  { %3549 = vmatpush3.bf16.msra.mxu1 %v3642_v37 }
  0x84   :  { %403 = vmatmul.mubr.bf16.gmra.mrb[12].mxu0 %v151_v21  ;;  %3550 = vmatprep.subr.bf16.mxu1 %v3643_v38 }
  0x85   :  { %3247 = vmatpush3.bf16.msra.mxu0 %v3637_v32 }
  0x86   :  { %3248 = vmatprep.subr.bf16.mxu0 %v3639_v34 }
  0x87   :  { %3551 = vmatpush3.bf16.msra.mxu1 %v3643_v38 }
  0x88   :  { %3552 = vmatprep.subr.bf16.mxu1 %v3644_v39 }
  0x89   :  { %3249 = vmatpush3.bf16.msra.mxu0 %v3640_v35 }
  0x8b   :  { %3553 = vmatpush3.bf16.msra.mxu1 %v3644_v39 }
  0xd4   :  { %v4267_v56 = vpop.permute.xlu0 %507 }
  0xd7   :  { %v4283_v18 = vpop.permute.xlu1 %517 }
  0xda   :  { %v4275_v10 = vpop.permute.xlu0 %512 }
  0xdb   :  { %v4296_v38 = vpop.permute.xlu1 %522 }
 0x13f   :  { %v3198_v40 = vpop.f32.mrb[0].mxu0 }
 0x140   :  { %v3199_v41 = vpop.f32.mrb[1].mxu0 }
 0x141   :  { %v3200_v42 = vadd.f32 %v3199_v41, %v3198_v40  ;;  %v3201_v43 = vpop.f32.mrb[2].mxu0  ;;  %v3532_v44 = vpop.f32.mrb[0].mxu1 }
 0x142   :  { %v3202_v46 = vpop.f32.mrb[3].mxu0  ;;  %v444_v47 = vpop.f32.mrb[1].mxu1 }
 0x143   :  { %v3203_v49 = vadd.f32 %v3202_v46, %v3201_v43  ;;  %v445_v50 = vadd.f32 %v3200_v42, %v444_v47  ;;  %v3533_v51 = vpop.f32.mrb[2].mxu1 }
 0x144   :  { %v447_v53 = vpop.f32.mrb[3].mxu1 }
 0x145   :  { %v479_v54 = vmul.f32 %v4262_v48, %v445_v50  ;;  %v448_v55 = vadd.f32 %v3203_v49, %v447_v53 }
 0x147   :  { %v491_v57 = vadd.f32 %v4264_v52, %v479_v54  ;;  %v480_v58 = vmul.f32 %v4262_v48, %v448_v55  ;;  %v3204_v59 = vpop.f32.mrb[4].mxu0 }
 0x148   :  { %v3205_v60 = vpop.f32.mrb[5].mxu0 }
 0x149   :  { %v498_v61 = vmax.f32 %v491_v57, 0.0  ;;  %v492_v62 = vadd.f32 %v4264_v52, %v480_v58  ;;  %v3206_v63 = vadd.f32 %v3205_v60, %v3204_v59  ;;  %v3207_v0 = vpop.f32.mrb[6].mxu0  ;;  %v4272_v1 = vpop.f32.mrb[4].mxu1 }
 0x14a   :  { %v3208_v3 = vpop.f32.mrb[7].mxu0  ;;  %v460_v4 = vpop.f32.mrb[5].mxu1 }
 0x14b   :  { %v540_v5 = vmul.f32 %v4267_v56, %v498_v61  ;;  %v499_v6 = vmax.f32 %v492_v62, 0.0  ;;  %v453_v7 = vadd.f32 %v3532_v44, %v3206_v63  ;;  %v3209_v8 = vadd.f32 %v3208_v3, %v3207_v0  ;;  %v3537_v9 = vpop.f32.mrb[6].mxu1  ;;  %v4307_v59 = vpop.permute.xlu0 %527 }
 0x14c   :  { %v463_v11 = vpop.f32.mrb[7].mxu1 }
 0x14d   :  { %v4278_v12 = vmul.f32 %v4275_v10, %v499_v6  ;;  %v481_v13 = vmul.f32 %v4262_v48, %v453_v7  ;;  %v456_v14 = vadd.f32 %v3533_v51, %v3209_v8  ;;  %v554_v15 = vrot.slane %v540_v5, 7  ;;  %v4315_v6 = vpop.permute.xlu1 %532 }
 0x14e   :  { %v575_v35 = vrot.slane %v540_v5, 1 }
 0x14f   :  { %v555_v16 = vrot.slane %v4278_v12, 7  ;;  %v493_v17 = vadd.f32 %v4264_v52, %v481_v13  ;;  %v3210_v19 = vpop.f32.mrb[8].mxu0  ;;  %v597_v20 = vpack.c.bf16 %v4278_v12, %v540_v5  ;;  %v482_v21 = vmul.f32 %v4262_v48, %v456_v14 }
 0x150   :  { %v3211_v22 = vpop.f32.mrb[9].mxu0  ;;  %v576_v33 = vrot.slane %v4278_v12, 1 }
 0x151   :  { %v556_v23 = vsel %vm98_vm0, %v554_v15, %v555_v16  ;;  %v500_v24 = vmax.f32 %v493_v17, 0.0  ;;  %v3212_v25 = vadd.f32 %v3211_v22, %v3210_v19  ;;  %v3213_v26 = vpop.f32.mrb[10].mxu0  ;;  %833 = vmatprep.mubr.bf16.mxu0 %v597_v20  ;;  %v494_v29 = vadd.f32 %v4264_v52, %v482_v21  ;;  %v4331_v21 = vpop.permute.xlu0 %537 }
 0x152   :  { %v2953_v27 = vpack.c.bf16 %v556_v23, %v554_v15  ;;  %v3214_v28 = vpop.f32.mrb[11].mxu0  ;;  %v577_v46 = vsel %vm120_vm1, %v575_v35, %v576_v33  ;;  %v3646_v35 = vld [vmem:[%s4545_s1 + $0x180] sm:$0xff]  }
 0x153   :  { %v4290_v30 = vmul.f32 %v4283_v18, %v500_v24  ;;  %v461_v31 = vadd.f32 %v3212_v25, %v460_v4  ;;  %v3215_v32 = vadd.f32 %v3214_v28, %v3213_v26  ;;  %v501_v34 = vmax.f32 %v494_v29, 0.0 }
 0x154   :  { %2954 = vmatmul.mubr.msk.bf16.vlgmr.msra.gmra.mrb[16].mxu0 %vm4138_vm4, %v2953_v27 }
 0x155   :  { %v483_v36 = vmul.f32 %v4262_v48, %v461_v31  ;;  %v464_v37 = vadd.f32 %v3215_v32, %v463_v11  ;;  %v578_v39 = vrot.slane %v4290_v30, 1  ;;  %v543_v40 = vmul.f32 %v4296_v38, %v501_v34  ;;  %v3645_v34 = vld [vmem:[%s4545_s1 + $0x1c0] sm:$0xff]  }
 0x156   :  { %v557_v41 = vrot.slane %v4290_v30, 7  ;;  %3286 = vmatprep.subr.bf16.mxu0 %v3645_v34 }
 0x157   :  { %v495_v42 = vadd.f32 %v4264_v52, %v483_v36  ;;  %v484_v43 = vmul.f32 %v4262_v48, %v464_v37  ;;  %v3216_v44 = vpop.f32.mrb[12].mxu0  ;;  %v579_v47 = vsel %vm120_vm1, %v576_v33, %v578_v39  ;;  %v559_v49 = vrot.slane %v543_v40, 7  ;;  %3287 = vmatpush3.bf16.msra.mxu0 %v3646_v35  ;;  %v3647_v36 = vld [vmem:[%s4545_s1 + $0x1c8] sm:$0xff]  }
 0x158   :  { %v3217_v50 = vpop.f32.mrb[13].mxu0  ;;  %v600_v51 = vpack.c.bf16 %v543_v40, %v4290_v30  ;;  %v598_v53 = vpack.c.bf16 %v579_v47, %v577_v46  ;;  %v580_v60 = vrot.slane %v543_v40, 1  ;;  %v558_v62 = vsel %vm98_vm0, %v555_v16, %v557_v41  ;;  %v3648_v37 = vld [vmem:[%s4545_s1 + $0x188] sm:$0xff]   ;;  %3288 = vmatprep.subr.bf16.mxu0 %v3647_v36  ;;  %v3649_v40 = vld [vmem:[%s4545_s1 + $0x1d0] sm:$0xff]   ;;  %v3655_v47 = vld [vmem:[%s4545_s1 + $0x1e0] sm:$0xff]  }
 0x159   :  { %v502_v54 = vmax.f32 %v495_v42, 0.0  ;;  %v496_v55 = vadd.f32 %v4264_v52, %v484_v43  ;;  %v3218_v57 = vadd.f32 %v3217_v50, %v3216_v44  ;;  %v3219_v58 = vpop.f32.mrb[14].mxu0  ;;  %v560_v63 = vsel %vm98_vm0, %v557_v41, %v559_v49  ;;  %v3651_v41 = vld [vmem:[%s4545_s1 + $0x190] sm:$0xff]   ;;  %v3653_v42 = vld [vmem:[%s4545_s1 + $0x208] sm:$0xff]   ;;  %v3652_v43 = vld [vmem:[%s4545_s1 + $0x1d8] sm:$0xff]  }
 0x15a   :  { %841 = vmatprep.mubr.bf16.mxu0 %v600_v51  ;;  %v3220_v61 = vpop.f32.mrb[15].mxu0  ;;  %3554 = vmatprep.mubr.bf16.mxu1 %v598_v53  ;;  %v599_v5 = vpack.c.bf16 %v560_v63, %v558_v62  ;;  %v3654_v44 = vld [vmem:[%s4545_s1 + $0x198] sm:$0xff]   ;;  %v3656_v46 = vld [vmem:[%s4545_s1 + $0x210] sm:$0xff]   ;;  %v3658_v51 = vld [vmem:[%s4545_s1 + $0x1e8] sm:$0xff]  }
 0x15b   :  { %v4312_v0 = vmul.f32 %v4307_v59, %v502_v54  ;;  %v503_v3 = vmax.f32 %v496_v55, 0.0  ;;  %v469_v4 = vadd.f32 %v4272_v1, %v3218_v57  ;;  %v581_v1 = vsel %vm120_vm1, %v578_v39, %v580_v60  ;;  %3289 = vmatpush3.bf16.msra.mxu0 %v3648_v37  ;;  %v3650_v39 = vld [vmem:[%s4545_s1 + $0x200] sm:$0xff]   ;;  %v3659_v50 = vld [vmem:[%s4545_s1 + $0x218] sm:$0xff]   ;;  %v3660_v53 = vld [vmem:[%s4545_s1 + $0x1a8] sm:$0xff]  }
 0x15c   :  { %842 = vmatmul.mubr.bf16.gmra.mrb[20].mxu0 %v599_v5  ;;  %3562 = vmatprep.subr.bf16.mxu1 %v3650_v39  ;;  %v3662_v54 = vld [vmem:[%s4545_s1 + $0x220] sm:$0xff]   ;;  %v3661_v55 = vld [vmem:[%s4545_s1 + $0x1f0] sm:$0xff]   ;;  %v3665_v58 = vld [vmem:[%s4545_s1 + $0x228] sm:$0xff]  }
 0x15d   :  { %v582_v7 = vrot.slane %v4312_v0, 1  ;;  %v4319_v8 = vmul.f32 %v4315_v6, %v503_v3  ;;  %v485_v9 = vmul.f32 %v4262_v48, %v469_v4  ;;  %v561_v11 = vrot.slane %v4312_v0, 7  ;;  %3290 = vmatprep.subr.bf16.mxu0 %v3649_v40  ;;  %v3663_v57 = vld [vmem:[%s4545_s1 + $0x1b0] sm:$0xff]   ;;  %v3666_v61 = vld [vmem:[%s4545_s1 + $0x1b8] sm:$0xff]  }
 0x15e   :  { %v3667_v62 = vld [vmem:[%s4545_s1 + $0x230] sm:$0xff]   ;;  %v3668_v63 = vld [vmem:[%s4545_s1 + $0x238] sm:$0xff]  }
 0x15f   :  { %v583_v13 = vsel %vm120_vm1, %v580_v60, %v582_v7  ;;  %v563_v14 = vrot.slane %v4319_v8, 7  ;;  %v497_v15 = vadd.f32 %v4264_v52, %v485_v9  ;;  %v603_v16 = vpack.c.bf16 %v4319_v8, %v4312_v0  ;;  %3291 = vmatpush3.bf16.msra.mxu0 %v3651_v41  ;;  %v3664_v60 = vld [vmem:[%s4545_s1 + $0x1f8] sm:$0xff]  }
 0x160   :  { %v601_v17 = vpack.c.bf16 %v583_v13, %v581_v1  ;;  %v562_v20 = vsel %vm98_vm0, %v559_v49, %v561_v11  ;;  %v584_v23 = vrot.slane %v4319_v8, 1  ;;  %3292 = vmatprep.subr.bf16.mxu0 %v3652_v43  ;;  %v3657_v49 = vld [vmem:[%s4545_s1 + $0x1a0] sm:$0xff]   ;;  %s3923_s1 = smov [#allocation10]  }
 0x161   :  { %v504_v19 = vmax.f32 %v497_v15, 0.0  ;;  %v564_v48 = vsel %vm98_vm0, %v561_v11, %v563_v14  ;;  %849 = vmatprep.mubr.bf16.mxu0 %v603_v16  ;;  %s2835_s29 = sshll.u32 %s3923_s1, 4  ;;  %s2836_s29 = int_to_ptr.vmem [resolvable:$true] %s2835_s29 }
 0x162   :  { %3555 = vmatmul.mubr.bf16.vlgmr.msra.gmra.mrb[8].mxu1 %v601_v17  ;;  %v602_v22 = vpack.c.bf16 %v564_v48, %v562_v20  ;;  %v585_v27 = vsel %vm120_vm1, %v582_v7, %v584_v23  ;;  %v4412_v20 = vld [vmem:[#allocation2 + $0x1] ss:$0 sm:$0xff]  ;;  %s3885_s30 = scalar_lea.vmem %s2836_s29, 32  ;;  %p3890_p5 = scmp.lt.s32.totalorder %s2836_s29, %s2836_s29 }
 0x163   :  { %v546_v52 = vmul.f32 %v4331_v21, %v504_v19  ;;  %3563 = vmatpush3.bf16.msra.mxu1 %v3650_v39  ;;  %3293 = vmatpush3.bf16.msra.mxu0 %v3654_v44  ;;  %p3886_p4 = scmp.ne.s32.totalorder %s2836_s29, %s3885_s30  ;;  %p3891_p6 = scmp.lt.s32.totalorder %s3885_s30, %s3885_s30 }
 0x164   :  { %850 = vmatmul.mubr.bf16.gmra.mrb[24].mxu0 %v602_v22  ;;  %3564 = vmatprep.subr.bf16.mxu1 %v3653_v42 }
 0x165   :  { %v606_v24 = vpack.c.bf16 %v546_v52, %v546_v52  ;;  %v586_v25 = vrot.slane %v546_v52, 1  ;;  %v565_v26 = vrot.slane %v546_v52, 7  ;;  %3294 = vmatprep.subr.bf16.mxu0 %v3655_v47  ;;  %p3892_p7 = por %p3891_p6, %p3890_p5 }
 0x167   :  { %857 = vmatprep.mubr.bf16.mxu0 %v606_v24  ;;  %v587_v28 = vsel %vm120_vm1, %v584_v23, %v586_v25  ;;  %v566_v31 = vsel %vm98_vm0, %v563_v14, %v565_v26  ;;  %v2956_v32 = vpack.c.bf16 %v586_v25, %v586_v25  ;;  %3565 = vmatpush3.bf16.msra.mxu1 %v3653_v42  ;;  %v4414_v23 = vld [vmem:[#allocation5 + $0x1] ss:$0 sm:$0xff]  ;;  %p3893_p8 = pnand %p3892_p7, %p3886_p4 }
 0x168   :  { %v604_v29 = vpack.c.bf16 %v587_v28, %v585_v27  ;;  %v605_v33 = vpack.c.bf16 %v566_v31, %v566_v31  ;;  %3566 = vmatprep.subr.bf16.mxu1 %v3656_v46  ;;  %3295 = vmatpush3.bf16.msra.mxu0 %v3657_v49 }
 0x169   :  { %3296 = vmatprep.subr.bf16.mxu0 %v3658_v51 }
 0x16a   :  { %3558 = vmatprep.mubr.bf16.mxu1 %v604_v29 }
 0x16b   :  { %3559 = vmatmul.mubr.msk.bf16.gmra.mrb[12].mxu1 %vm4173_vm5, %v2956_v32 }
 0x16c   :  { %858 = vmatmul.mubr.bf16.gmra.mrb[28].mxu0 %v605_v33  ;;  %3567 = vmatpush3.bf16.msra.mxu1 %v3656_v46 }
 0x16d   :  { %3568 = vmatprep.subr.bf16.mxu1 %v3659_v50  ;;  %3297 = vmatpush3.bf16.msra.mxu0 %v3660_v53 }
 0x16e   :  { %3298 = vmatprep.subr.bf16.mxu0 %v3661_v55 }
 0x170   :  { %3569 = vmatpush3.bf16.msra.mxu1 %v3659_v50 }
 0x171   :  { %3570 = vmatprep.subr.bf16.mxu1 %v3662_v54  ;;  %3299 = vmatpush3.bf16.msra.mxu0 %v3663_v57 }
 0x172   :  { %3300 = vmatprep.subr.bf16.mxu0 %v3664_v60 }
 0x174   :  { %3571 = vmatpush3.bf16.msra.mxu1 %v3662_v54 }
 0x175   :  { %3572 = vmatprep.subr.bf16.mxu1 %v3665_v58  ;;  %3301 = vmatpush3.bf16.msra.mxu0 %v3666_v61 }
 0x178   :  { %3573 = vmatpush3.bf16.msra.mxu1 %v3665_v58 }
 0x179   :  { %3574 = vmatprep.subr.bf16.mxu1 %v3667_v62 }
 0x17c   :  { %3575 = vmatpush3.bf16.msra.mxu1 %v3667_v62 }
 0x17d   :  { %3576 = vmatprep.subr.bf16.mxu1 %v3668_v63 }
 0x180   :  { %3577 = vmatpush3.bf16.msra.mxu1 %v3668_v63 }
 0x227   :  { %v3250_v3 = vpop.f32.mrb[16].mxu0 }
 0x228   :  { %v3251_v4 = vpop.f32.mrb[17].mxu0 }
 0x229   :  { %v3252_v5 = vadd.f32 %v3251_v4, %v3250_v3  ;;  %v3253_v7 = vpop.f32.mrb[18].mxu0 }
 0x22a   :  { %v3254_v9 = vpop.f32.mrb[19].mxu0 }
 0x22b   :  { %v3255_v11 = vadd.f32 %v3254_v9, %v3253_v7 }
 0x22f   :  { %v3256_v13 = vpop.f32.mrb[20].mxu0 }
 0x230   :  { %v3257_v14 = vpop.f32.mrb[21].mxu0 }
 0x231   :  { %v3258_v15 = vadd.f32 %v3257_v14, %v3256_v13  ;;  %v3259_v1 = vpop.f32.mrb[22].mxu0 }
 0x232   :  { %v3260_v16 = vpop.f32.mrb[23].mxu0 }
 0x233   :  { %v3261_v17 = vadd.f32 %v3260_v16, %v3259_v1 }
 0x235   :  { %v3556_v19 = vpop.f32.mrb[8].mxu1 }
 0x236   :  { %v908_v48 = vadd.f32 %v3556_v19, %v3258_v15  ;;  %v899_v22 = vpop.f32.mrb[9].mxu1 }
 0x237   :  { %v900_v52 = vadd.f32 %v3252_v5, %v899_v22  ;;  %v3557_v24 = vpop.f32.mrb[10].mxu1  ;;  %v3262_v26 = vpop.f32.mrb[24].mxu0 }
 0x238   :  { %v936_v25 = vmul.f32 %v4412_v20, %v908_v48  ;;  %v911_v27 = vadd.f32 %v3557_v24, %v3261_v17  ;;  %v902_v28 = vpop.f32.mrb[11].mxu1  ;;  %v3263_v31 = vpop.f32.mrb[25].mxu0 }
 0x239   :  { %v934_v29 = vmul.f32 %v4412_v20, %v900_v52  ;;  %v903_v32 = vadd.f32 %v3255_v11, %v902_v28  ;;  %v3264_v35 = vadd.f32 %v3263_v31, %v3262_v26  ;;  %v3265_v36 = vpop.f32.mrb[26].mxu0 }
 0x23a   :  { %v948_v33 = vadd.f32 %v4414_v23, %v936_v25  ;;  %v937_v34 = vmul.f32 %v4412_v20, %v911_v27  ;;  %v3266_v40 = vpop.f32.mrb[27].mxu0 }
 0x23b   :  { %v946_v37 = vadd.f32 %v4414_v23, %v934_v29  ;;  %v935_v39 = vmul.f32 %v4412_v20, %v903_v32  ;;  %v3267_v43 = vadd.f32 %v3266_v40, %v3265_v36 }
 0x23c   :  { %v955_v41 = vmax.f32 %v948_v33, 0.0  ;;  %v949_v42 = vadd.f32 %v4414_v23, %v937_v34 }
 0x23d   :  { %v953_v44 = vmax.f32 %v946_v37, 0.0  ;;  %v947_v46 = vadd.f32 %v4414_v23, %v935_v39 }
 0x23e   :  { %v962_v47 = vmul.f32 %v955_v41, %v4283_v18  ;;  %v956_v49 = vmax.f32 %v949_v42, 0.0  ;;  %v3560_v50 = vpop.f32.mrb[12].mxu1 }
 0x23f   :  { %v960_v51 = vmul.f32 %v953_v44, %v4267_v56  ;;  %v954_v53 = vmax.f32 %v947_v46, 0.0  ;;  %v915_v54 = vpop.f32.mrb[13].mxu1  ;;  %v3268_v57 = vpop.f32.mrb[28].mxu0 }
 0x240   :  { %v963_v55 = vmul.f32 %v956_v49, %v4296_v38  ;;  %v916_v58 = vadd.f32 %v3264_v35, %v915_v54  ;;  %v3561_v60 = vpop.f32.mrb[14].mxu1  ;;  %v998_v61 = vrot.slane %v962_v47, 1  ;;  %v3269_v3 = vpop.f32.mrb[29].mxu0  ;;  %v977_v7 = vrot.slane %v962_v47, 7 }
 0x241   :  { %v974_v62 = vrot.slane %v960_v51, 7  ;;  %v961_v63 = vmul.f32 %v954_v53, %v4275_v10  ;;  %v918_v4 = vpop.f32.mrb[15].mxu1  ;;  %v995_v5 = vrot.slane %v960_v51, 1  ;;  %v3270_v11 = vadd.f32 %v3269_v3, %v3268_v57  ;;  %v3271_v56 = vpop.f32.mrb[30].mxu0  ;;  %v3669_v60 = vld [vmem:[#allocation7 + $0x40] sm:$0xff]   ;;  %v3673_v3 = vld [vmem:[#allocation7 + $0x48] sm:$0xff]  }
 0x242   :  { %v1000_v18 = vrot.slane %v963_v55, 1  ;;  %v938_v9 = vmul.f32 %v4412_v20, %v916_v58  ;;  %v919_v13 = vadd.f32 %v3267_v43, %v918_v4  ;;  %v3272_v15 = vpop.f32.mrb[31].mxu0  ;;  %v1020_v16 = vpack.c.bf16 %v963_v55, %v962_v47  ;;  %3338 = vmatprep.subr.bf16.mxu0 %v3669_v60  ;;  %v3674_v4 = vld [vmem:[#allocation7 + $0x8] sm:$0xff]   ;;  %v3681_v56 = vld [vmem:[#allocation7 + $0x58] sm:$0xff]  }
 0x243   :  { %v975_v14 = vrot.slane %v961_v63, 7  ;;  %v1017_v38 = vpack.c.bf16 %v961_v63, %v960_v51  ;;  %v996_v1 = vrot.slane %v961_v63, 1  ;;  %v924_v19 = vadd.f32 %v3560_v50, %v3270_v11  ;;  %v3672_v63 = vld [vmem:[#allocation7 + $0x80] sm:$0xff]   ;;  %v3680_v11 = vld [vmem:[#allocation7 + $0x90] sm:$0xff]   ;;  %v3684_v15 = vld [vmem:[#allocation7 + $0x98] sm:$0xff]  }
 0x244   :  { %v950_v17 = vadd.f32 %v4414_v23, %v938_v9  ;;  %v939_v10 = vmul.f32 %v4412_v20, %v919_v13  ;;  %v1001_v48 = vsel %vm120_vm1, %v998_v61, %v1000_v18  ;;  %v979_v32 = vrot.slane %v963_v55, 7  ;;  %v3679_v9 = vld [vmem:[#allocation7 + $0xd0] sm:$0xff]   ;;  %v3682_v13 = vld [vmem:[#allocation7 + $0x18] sm:$0xff]  }
 0x245   :  { %v976_v22 = vsel %vm98_vm0, %v974_v62, %v975_v14  ;;  %1253 = vmatprep.mubr.bf16.mxu0 %v1017_v38  ;;  %v997_v52 = vsel %vm120_vm1, %v995_v5, %v996_v1  ;;  %v999_v24 = vsel %vm120_vm1, %v996_v1, %v998_v61  ;;  %v978_v25 = vsel %vm98_vm0, %v975_v14, %v977_v7  ;;  %v3670_v61 = vld [vmem:[#allocation7] sm:$0xff]   ;;  %v3675_v5 = vld [vmem:[#allocation7 + $0xc8] sm:$0xff]   ;;  %v3683_v14 = vld [vmem:[#allocation7 + $0xd8] sm:$0xff]  }
 0x246   :  { %v3034_v26 = vpack.c.bf16 %v976_v22, %v974_v62  ;;  %v957_v27 = vmax.f32 %v950_v17, 0.0  ;;  %v940_v28 = vmul.f32 %v4412_v20, %v924_v19  ;;  %v951_v29 = vadd.f32 %v4414_v23, %v939_v10  ;;  %v3671_v62 = vld [vmem:[#allocation7 + $0xc0] sm:$0xff]   ;;  %v3689_v19 = vld [vmem:[#allocation7 + $0x68] sm:$0xff]  }
 0x247   :  { %v1018_v31 = vpack.c.bf16 %v999_v24, %v997_v52  ;;  %v980_v36 = vsel %vm98_vm0, %v977_v7, %v979_v32  ;;  %3360 = vmatprep.subr.bf16.mxu1 %v3671_v62  ;;  %v3676_v7 = vld [vmem:[#allocation7 + $0x88] sm:$0xff]   ;;  %v3685_v38 = vld [vmem:[#allocation7 + $0x60] sm:$0xff]   ;;  %v3693_v52 = vld [vmem:[#allocation7 + $0x70] sm:$0xff]  }
 0x248   :  { %v964_v33 = vmul.f32 %v957_v27, %v4307_v59  ;;  %v952_v34 = vadd.f32 %v4414_v23, %v940_v28  ;;  %v958_v35 = vmax.f32 %v951_v29, 0.0  ;;  %3035 = vmatmul.mubr.msk.bf16.vlgmr.msra.gmra.mrb[32].mxu0 %vm4138_vm4, %v3034_v26  ;;  %v1019_v40 = vpack.c.bf16 %v980_v36, %v978_v25  ;;  %v3686_v1 = vld [vmem:[#allocation7 + $0x20] sm:$0xff]   ;;  %v3690_v10 = vld [vmem:[#allocation7 + $0x28] sm:$0xff]   ;;  %v3694_v24 = vld [vmem:[#allocation7 + $0x30] sm:$0xff]  }
 0x249   :  { %3578 = vmatprep.mubr.bf16.mxu1 %v1018_v31  ;;  %1260 = vmatprep.mubr.bf16.mxu0 %v1020_v16  ;;  %v3687_v16 = vld [vmem:[#allocation7 + $0xe0] sm:$0xff]   ;;  %v3692_v22 = vld [vmem:[#allocation7 + $0xa8] sm:$0xff]   ;;  %v3695_v25 = vld [vmem:[#allocation7 + $0xf0] sm:$0xff]  }
 0x24a   :  { %v1002_v37 = vrot.slane %v964_v33, 1  ;;  %v959_v39 = vmax.f32 %v952_v34, 0.0  ;;  %v965_v20 = vmul.f32 %v958_v35, %v4315_v6  ;;  %v981_v41 = vrot.slane %v964_v33, 7  ;;  %3339 = vmatpush3.bf16.msra.mxu0 %v3670_v61  ;;  %v3688_v17 = vld [vmem:[#allocation7 + $0xa0] sm:$0xff]   ;;  %v3696_v26 = vld [vmem:[#allocation7 + $0xb0] sm:$0xff]   ;;  %v3697_v27 = vld [vmem:[#allocation7 + $0x78] sm:$0xff]  }
 0x24b   :  { %3340 = vmatprep.subr.bf16.mxu0 %v3673_v3  ;;  %v3699_v28 = vld [vmem:[#allocation7 + $0xf8] sm:$0xff]  }
 0x24c   :  { %v966_v42 = vmul.f32 %v959_v39, %v4331_v21  ;;  %v1003_v59 = vsel %vm120_vm1, %v1000_v18, %v1002_v37  ;;  %v1023_v43 = vpack.c.bf16 %v965_v20, %v964_v33  ;;  %v1004_v23 = vrot.slane %v965_v20, 1  ;;  %v3678_v18 = vld [vmem:[#allocation7 + $0x10] sm:$0xff]   ;;  %v3698_v29 = vld [vmem:[#allocation7 + $0x38] sm:$0xff]   ;;  %v3703_v33 = vld [vmem:[#allocation7 + $0x1c0] sm:$0xff]  }
 0x24d   :  { %v1021_v44 = vpack.c.bf16 %v1003_v59, %v1001_v48  ;;  %v982_v45 = vsel %vm98_vm0, %v979_v32, %v981_v41  ;;  %v983_v46 = vrot.slane %v965_v20, 7  ;;  %v3691_v48 = vld [vmem:[#allocation7 + $0xe8] sm:$0xff]   ;;  %v3700_v31 = vld [vmem:[#allocation7 + $0xb8] sm:$0xff]   ;;  %v3701_v32 = vld [vmem:[#allocation7 + $0x140] sm:$0xff]  }
 0x24e   :  { %v1005_v47 = vsel %vm120_vm1, %v1002_v37, %v1004_v23  ;;  %v1006_v49 = vrot.slane %v966_v42, 1  ;;  %v985_v50 = vrot.slane %v966_v42, 7  ;;  %v1026_v57 = vpack.c.bf16 %v966_v42, %v966_v42  ;;  %3341 = vmatpush3.bf16.msra.mxu0 %v3674_v4 }
 0x24f   :  { %3579 = vmatmul.mubr.bf16.vlgmr.msra.gmra.mrb[16].mxu1 %v1021_v44  ;;  %v984_v51 = vsel %vm98_vm0, %v981_v41, %v983_v46  ;;  %3342 = vmatprep.subr.bf16.mxu0 %v3677_v2 }
 0x250   :  { %1261 = vmatmul.mubr.bf16.gmra.mrb[36].mxu0 %v1019_v40  ;;  %v1007_v6 = vsel %vm120_vm1, %v1004_v23, %v1006_v49  ;;  %v1022_v53 = vpack.c.bf16 %v984_v51, %v982_v45  ;;  %v986_v21 = vsel %vm98_vm0, %v983_v46, %v985_v50  ;;  %v3037_v55 = vpack.c.bf16 %v1006_v49, %v1006_v49  ;;  %v3039_v23 = vld [vmem:[#allocation2 + $0x2] ss:$0 sm:$0xff]  ;;  %v3040_v50 = vld [vmem:[#allocation5 + $0x2] ss:$0 sm:$0xff] }
 0x251   :  { %1267 = vmatprep.mubr.bf16.mxu0 %v1023_v43  ;;  %v1024_v54 = vpack.c.bf16 %v1007_v6, %v1005_v47  ;;  %v1025_v58 = vpack.c.bf16 %v986_v21, %v986_v21  ;;  %3361 = vmatpush3.bf16.msra.mxu1 %v3672_v63 }
 0x252   :  { %3362 = vmatprep.subr.bf16.mxu1 %v3675_v5  ;;  %3343 = vmatpush3.bf16.msra.mxu0 %v3678_v18 }
 0x253   :  { %3582 = vmatprep.mubr.bf16.mxu1 %v1024_v54  ;;  %3344 = vmatprep.subr.bf16.mxu0 %v3681_v56 }
 0x255   :  { %3363 = vmatpush3.bf16.msra.mxu1 %v3676_v7 }
 0x256   :  { %3364 = vmatprep.subr.bf16.mxu1 %v3679_v9  ;;  %3345 = vmatpush3.bf16.msra.mxu0 %v3682_v13 }
 0x257   :  { %3583 = vmatmul.mubr.msk.bf16.gmra.mrb[20].mxu1 %vm4173_vm5, %v3037_v55  ;;  %3346 = vmatprep.subr.bf16.mxu0 %v3685_v38 }
 0x258   :  { %1268 = vmatmul.mubr.bf16.gmra.mrb[40].mxu0 %v1022_v53 }
 0x259   :  { %1275 = vmatprep.mubr.bf16.mxu0 %v1026_v57  ;;  %3365 = vmatpush3.bf16.msra.mxu1 %v3680_v11 }
 0x25a   :  { %3366 = vmatprep.subr.bf16.mxu1 %v3683_v14  ;;  %3347 = vmatpush3.bf16.msra.mxu0 %v3686_v1 }
 0x25b   :  { %3348 = vmatprep.subr.bf16.mxu0 %v3689_v19 }
 0x25d   :  { %3367 = vmatpush3.bf16.msra.mxu1 %v3684_v15 }
 0x25e   :  { %3368 = vmatprep.subr.bf16.mxu1 %v3687_v16  ;;  %3349 = vmatpush3.bf16.msra.mxu0 %v3690_v10 }
 0x25f   :  { %3350 = vmatprep.subr.bf16.mxu0 %v3693_v52 }
 0x260   :  { %1276 = vmatmul.mubr.bf16.gmra.mrb[44].mxu0 %v1025_v58 }
 0x261   :  { %3369 = vmatpush3.bf16.msra.mxu1 %v3688_v17 }
 0x262   :  { %3370 = vmatprep.subr.bf16.mxu1 %v3691_v48  ;;  %3351 = vmatpush3.bf16.msra.mxu0 %v3694_v24 }
 0x263   :  { %3352 = vmatprep.subr.bf16.mxu0 %v3697_v27 }
 0x265   :  { %3371 = vmatpush3.bf16.msra.mxu1 %v3692_v22 }
 0x266   :  { %3372 = vmatprep.subr.bf16.mxu1 %v3695_v25  ;;  %3353 = vmatpush3.bf16.msra.mxu0 %v3698_v29 }
 0x267   :  { %3382 = vmatprep.subr.bf16.mxu0 %v3701_v32 }
 0x269   :  { %3373 = vmatpush3.bf16.msra.mxu1 %v3696_v26 }
 0x26a   :  { %3374 = vmatprep.subr.bf16.mxu1 %v3699_v28 }
 0x26d   :  { %3375 = vmatpush3.bf16.msra.mxu1 %v3700_v31 }
 0x26e   :  { %3404 = vmatprep.subr.bf16.mxu1 %v3703_v33 }
 0x31b   :  { %v3302_v34 = vpop.f32.mrb[32].mxu0 }
 0x31c   :  { %v3303_v35 = vpop.f32.mrb[33].mxu0 }
 0x31d   :  { %v3305_v36 = vpop.f32.mrb[34].mxu0 }
 0x31e   :  { %v3306_v37 = vpop.f32.mrb[35].mxu0 }
 0x31f   :  { %v3307_v39 = vadd.f32 %v3306_v37, %v3305_v36 }
 0x322   :  { %v3580_v20 = vpop.f32.mrb[16].mxu1 }
 0x323   :  { %v3308_v40 = vpop.f32.mrb[36].mxu0  ;;  %v1316_v41 = vpop.f32.mrb[17].mxu1 }
 0x324   :  { %v3309_v42 = vpop.f32.mrb[37].mxu0  ;;  %v3581_v59 = vpop.f32.mrb[18].mxu1 }
 0x325   :  { %v3310_v43 = vadd.f32 %v3309_v42, %v3308_v40  ;;  %v3311_v44 = vpop.f32.mrb[38].mxu0  ;;  %v1318_v45 = vpop.f32.mrb[19].mxu1 }
 0x326   :  { %v1319_v46 = vadd.f32 %v3307_v39, %v1318_v45  ;;  %v3312_v47 = vpop.f32.mrb[39].mxu0  ;;  %v3702_v39 = vld [vmem:[#allocation7 + $0x100] sm:$0xff]  }
 0x327   :  { %v1324_v49 = vadd.f32 %v3580_v20, %v3310_v43  ;;  %v3705_v47 = vld [vmem:[#allocation7 + $0x148] sm:$0xff]  }
 0x328   :  { %v1348_v51 = vmul.f32 %v3039_v23, %v1319_v46 }
 0x329   :  { %v1349_v6 = vmul.f32 %v3039_v23, %v1324_v49 }
 0x32a   :  { %v1357_v53 = vadd.f32 %v3040_v50, %v1348_v51  ;;  %v3584_v21 = vpop.f32.mrb[20].mxu1  ;;  %v3707_v51 = vld [vmem:[#allocation7 + $0x1c8] sm:$0xff]  }
 0x32b   :  { %v3314_v54 = vpop.f32.mrb[40].mxu0  ;;  %v1330_v55 = vpop.f32.mrb[21].mxu1  ;;  %v1358_v57 = vadd.f32 %v3040_v50, %v1349_v6 }
 0x32c   :  { %v3315_v58 = vpop.f32.mrb[41].mxu0  ;;  %v3585_v60 = vpop.f32.mrb[22].mxu1  ;;  %v1361_v3 = vadd.f32 %v1357_v53, %v4278_v12 }
 0x32d   :  { %v3316_v61 = vadd.f32 %v3315_v58, %v3314_v54  ;;  %v3317_v62 = vpop.f32.mrb[42].mxu0  ;;  %v1333_v63 = vpop.f32.mrb[23].mxu1  ;;  %v1362_v2 = vadd.f32 %v1358_v57, %v4290_v30  ;;  %v3706_v54 = vld [vmem:[#allocation7 + $0x108] sm:$0xff]  }
 0x32e   :  { %v3318_v4 = vpop.f32.mrb[43].mxu0  ;;  %v1365_v11 = vmax.f32 %v1361_v3, 0.0 }
 0x32f   :  { %v1331_v5 = vadd.f32 %v3316_v61, %v1330_v55  ;;  %v3319_v7 = vadd.f32 %v3318_v4, %v3317_v62  ;;  %v4455_v15 = vmax.f32 %v1362_v2, 0.0  ;;  %v3708_v61 = vld [vmem:[#allocation7 + $0x188] sm:$0xff]   ;;  %v3709_v62 = vld [vmem:[#allocation7 + $0x150] sm:$0xff]  }
 0x330   :  { %v1370_v12 = vrot.slane %v1365_v11, 1  ;;  %v1374_v10 = vrot.slane %v1365_v11, 3  ;;  %v1372_v48 = vrot.slane %v1365_v11, 2  ;;  %v1378_v52 = vrot.slane %v1365_v11, 5 }
 0x331   :  { %v1350_v18 = vmul.f32 %v3039_v23, %v1331_v5  ;;  %v1334_v9 = vadd.f32 %v3319_v7, %v1333_v63  ;;  %v1382_v24 = vrot.slane %v1365_v11, 7  ;;  %v1376_v25 = vrot.slane %v1365_v11, 4  ;;  %v3711_v7 = vld [vmem:[#allocation7 + $0x1d0] sm:$0xff]  }
 0x332   :  { %v1380_v26 = vrot.slane %v1365_v11, 6  ;;  %v1385_v27 = vrot.slane %v4455_v15, 1  ;;  %v1389_v28 = vrot.slane %v4455_v15, 3  ;;  %v1387_v21 = vrot.slane %v4455_v15, 2 }
 0x333   :  { %v1359_v56 = vadd.f32 %v3040_v50, %v1350_v18  ;;  %v1351_v13 = vmul.f32 %v3039_v23, %v1334_v9  ;;  %v3320_v14 = vpop.f32.mrb[44].mxu0  ;;  %v3704_v23 = vld [vmem:[#allocation7 + $0x180] sm:$0xff]   ;;  %v1393_v60 = vrot.slane %v4455_v15, 5  ;;  %v1391_v4 = vrot.slane %v4455_v15, 4 }
 0x334   :  { %v3321_v38 = vpop.f32.mrb[45].mxu0  ;;  %v1397_v9 = vrot.slane %v4455_v15, 7  ;;  %v3710_v14 = vld [vmem:[#allocation7 + $0x110] sm:$0xff]  }
 0x335   :  { %v1363_v1 = vadd.f32 %v1359_v56, %v4312_v0  ;;  %v1360_v16 = vadd.f32 %v3040_v50, %v1351_v13  ;;  %v3323_v17 = vpop.f32.mrb[46].mxu0 }
 0x336   :  { %v3324_v19 = vpop.f32.mrb[47].mxu0  ;;  %v3712_v17 = vld [vmem:[#allocation7 + $0x190] sm:$0xff]  }
 0x337   :  { %v1367_v22 = vmax.f32 %v1363_v1, 0.0  ;;  %v1364_v30 = vadd.f32 %v1360_v16, %v4319_v8  ;;  %v1395_v1 = vrot.slane %v4455_v15, 6  ;;  %v3713_v19 = vld [vmem:[#allocation7 + $0x158] sm:$0xff]  }
 0x339   :  { %v4461_v29 = vmax.f32 %v1364_v30, 0.0  ;;  %v1446_v0 = vsel %vm98_vm0, %v1370_v12, %v1367_v22  ;;  %v1406_v31 = vrot.slane %v1367_v22, 7  ;;  %v3043_v32 = vrot.slane %v1367_v22, 10  ;;  %v3715_v12 = vld [vmem:[#allocation7 + $0x1d8] sm:$0xff]   ;;  %v3717_v30 = vld [vmem:[#allocation7 + $0x160] sm:$0xff]  }
 0x33a   :  { %v1462_v33 = vpack.c.bf16 %v1446_v0, %v1446_v0  ;;  %v3042_v34 = vrot.slane %v1367_v22, 9  ;;  %v3045_v35 = vrot.slane %v1367_v22, 12  ;;  %v3044_v36 = vrot.slane %v1367_v22, 11  ;;  %v3727_v0 = vld [vmem:[#allocation7 + $0x1f0] sm:$0xff]  }
 0x33b   :  { %v1445_v8 = vsel %vm98_vm0, %v1365_v11, %v1406_v31  ;;  %v1448_v37 = vsel %vm98_vm0, %v1374_v10, %v3043_v32  ;;  %v1421_v20 = vrot.slane %v1406_v31, 7  ;;  %v3046_v40 = vrot.slane %v1367_v22, 13  ;;  %v3716_v22 = vld [vmem:[#allocation7 + $0x198] sm:$0xff]   ;;  %v3726_v31 = vld [vmem:[#allocation7 + $0x130] sm:$0xff]  }
 0x33c   :  { %2540 = vmatprep.mubr.bf16.mxu0 %v1462_v33  ;;  %v1461_v41 = vpack.c.bf16 %v1445_v8, %v1445_v8  ;;  %v1464_v42 = vpack.c.bf16 %v1448_v37, %v1448_v37  ;;  %v1447_v59 = vsel %vm98_vm0, %v1372_v48, %v3042_v34  ;;  %v1450_v43 = vsel %vm98_vm0, %v1378_v52, %v3045_v35  ;;  %v3714_v48 = vld [vmem:[#allocation7 + $0x118] sm:$0xff]   ;;  %v3719_v52 = vld [vmem:[#allocation7 + $0x1e0] sm:$0xff]   ;;  %v3728_v32 = vld [vmem:[#allocation7 + $0x1b0] sm:$0xff]  }
 0x33d   :  { %v1463_v44 = vpack.c.bf16 %v1447_v59, %v1447_v59  ;;  %v1466_v45 = vpack.c.bf16 %v1450_v43, %v1450_v43  ;;  %v1452_v46 = vsel %vm98_vm0, %v1382_v24, %v1421_v20  ;;  %v4470_v49 = vsel %vm98_vm0, %v1376_v25, %v3044_v36  ;;  %v3720_v24 = vld [vmem:[#allocation7 + $0x1a0] sm:$0xff]   ;;  %v3721_v25 = vld [vmem:[#allocation7 + $0x168] sm:$0xff]   ;;  %v3729_v33 = vld [vmem:[#allocation7 + $0x178] sm:$0xff]  }
 0x33e   :  { %2541 = vmatmul.mubr.bf16.vlgmr.msra.gmra.mrb[48].mxu0 %v1461_v41  ;;  %2580 = vmatprep.mubr.bf16.mxu1 %v1464_v42  ;;  %v1468_v50 = vpack.c.bf16 %v1452_v46, %v1452_v46  ;;  %v4473_v6 = vsel %vm98_vm0, %v1380_v26, %v3046_v40  ;;  %v3049_v53 = vrot.slane %v4461_v29, 10  ;;  %v4479_v55 = vsel %vm98_vm0, %v1385_v27, %v4461_v29  ;;  %v3723_v26 = vld [vmem:[#allocation7 + $0x1e8] sm:$0xff]   ;;  %v3731_v34 = vld [vmem:[#allocation7 + $0x1f8] sm:$0xff]   ;;  %v3733_v8 = vld [vmem:[#allocation7 + $0x240] sm:$0xff]  }
 0x33f   :  { %3383 = vmatpush3.bf16.msra.mxu0 %v3702_v39  ;;  %2581 = vmatmul.mubr.bf16.vlgmr.msra.gmra.mrb[24].mxu1 %v1463_v44  ;;  %v1414_v57 = vrot.slane %v4461_v29, 7  ;;  %v3048_v58 = vrot.slane %v4461_v29, 9  ;;  %v3051_v3 = vrot.slane %v4461_v29, 12  ;;  %v3050_v5 = vrot.slane %v4461_v29, 11  ;;  %v3722_v27 = vld [vmem:[#allocation7 + $0x128] sm:$0xff]   ;;  %v3730_v35 = vld [vmem:[#allocation7 + $0x138] sm:$0xff]  }
 0x340   :  { %2620 = vmatprep.mubr.bf16.mxu0 %v1466_v45  ;;  %3405 = vmatpush3.bf16.msra.mxu1 %v3704_v23  ;;  %v4485_v63 = vsel %vm98_vm0, %v1389_v28, %v3049_v53  ;;  %v3052_v16 = vrot.slane %v4461_v29, 13  ;;  %v3724_v28 = vld [vmem:[#allocation7 + $0x1a8] sm:$0xff]   ;;  %v3725_v29 = vld [vmem:[#allocation7 + $0x170] sm:$0xff]   ;;  %v3732_v36 = vld [vmem:[#allocation7 + $0x1b8] sm:$0xff]   ;;  %v1465_v20 = vpack.c.bf16 %v4470_v49, %v4470_v49  ;;  %v1467_v41 = vpack.c.bf16 %v4473_v6, %v4473_v6 }
 0x341   :  { %2660 = vmatprep.mubr.bf16.mxu1 %v1468_v50  ;;  %3384 = vmatprep.subr.bf16.mxu0 %v3705_v47  ;;  %v4492_v2 = vsel %vm98_vm0, %v4455_v15, %v1414_v57  ;;  %v4495_v18 = vsel %vm98_vm0, %v1387_v21, %v3048_v58  ;;  %v1428_v11 = vrot.slane %v1414_v57, 7  ;;  %v4499_v56 = vsel %vm98_vm0, %v1393_v60, %v3051_v3  ;;  %v3718_v15 = vld [vmem:[#allocation7 + $0x120] sm:$0xff]   ;;  %v3737_v42 = vld [vmem:[#allocation7 + $0x248] sm:$0xff]   ;;  %v3741_v46 = vld [vmem:[#allocation7 + $0x250] sm:$0xff]  }
 0x342   :  { %3406 = vmatprep.subr.bf16.mxu1 %v3707_v51  ;;  %v4502_v13 = vsel %vm98_vm0, %v1391_v4, %v3050_v5  ;;  %v4510_v10 = vsel %vm98_vm0, %v1395_v1, %v3052_v16  ;;  %v3735_v37 = vld [vmem:[#allocation7 + $0x2c0] sm:$0xff]   ;;  %v1470_v59 = vpack.c.bf16 %v4479_v55, %v4479_v55  ;;  %v3739_v43 = vld [vmem:[#allocation7 + $0x2c8] sm:$0xff]   ;;  %v1472_v23 = vpack.c.bf16 %v4485_v63, %v4485_v63  ;;  %v3743_v47 = vld [vmem:[#allocation7 + $0x2d0] sm:$0xff]  }
 0x343   :  { %3385 = vmatpush3.bf16.msra.mxu0 %v3706_v54  ;;  %v4505_v38 = vsel %vm98_vm0, %v1397_v9, %v1428_v11  ;;  %v3734_v39 = vld [vmem:[#allocation7 + $0x200] sm:$0xff]   ;;  %v3738_v44 = vld [vmem:[#allocation7 + $0x208] sm:$0xff]   ;;  %v3742_v49 = vld [vmem:[#allocation7 + $0x210] sm:$0xff]  }
 0x344   :  { %3407 = vmatpush3.bf16.msra.mxu1 %v3708_v61  ;;  %3386 = vmatprep.subr.bf16.mxu0 %v3709_v62  ;;  %v3736_v40 = vld [vmem:[#allocation7 + $0x280] sm:$0xff]   ;;  %v3740_v45 = vld [vmem:[#allocation7 + $0x288] sm:$0xff]   ;;  %v3744_v50 = vld [vmem:[#allocation7 + $0x290] sm:$0xff]  }
 0x345   :  { %3408 = vmatprep.subr.bf16.mxu1 %v3711_v7  ;;  %v3745_v51 = vld [vmem:[#allocation7 + $0x258] sm:$0xff]   ;;  %v3749_v54 = vld [vmem:[#allocation7 + $0x260] sm:$0xff]   ;;  %v3753_v60 = vld [vmem:[#allocation7 + $0x268] sm:$0xff]  }
 0x346   :  { %v3747_v6 = vld [vmem:[#allocation7 + $0x2d8] sm:$0xff]   ;;  %v3751_v55 = vld [vmem:[#allocation7 + $0x2e0] sm:$0xff]   ;;  %v3755_v61 = vld [vmem:[#allocation7 + $0x2e8] sm:$0xff]  }
 0x347   :  { %3387 = vmatpush3.bf16.msra.mxu0 %v3710_v14  ;;  %v3746_v53 = vld [vmem:[#allocation7 + $0x218] sm:$0xff]   ;;  %v3750_v57 = vld [vmem:[#allocation7 + $0x220] sm:$0xff]   ;;  %v3754_v62 = vld [vmem:[#allocation7 + $0x228] sm:$0xff]  }
 0x348   :  { %3409 = vmatpush3.bf16.msra.mxu1 %v3712_v17  ;;  %3388 = vmatprep.subr.bf16.mxu0 %v3713_v19  ;;  %v3748_v21 = vld [vmem:[#allocation7 + $0x298] sm:$0xff]   ;;  %v3752_v58 = vld [vmem:[#allocation7 + $0x2a0] sm:$0xff]   ;;  %v3756_v63 = vld [vmem:[#allocation7 + $0x2a8] sm:$0xff]  }
 0x349   :  { %3410 = vmatprep.subr.bf16.mxu1 %v3715_v12  ;;  %v3757_v3 = vld [vmem:[#allocation7 + $0x270] sm:$0xff]   ;;  %v3761_v9 = vld [vmem:[#allocation7 + $0x278] sm:$0xff]   ;;  %v3765_v16 = vld [vmem:[#allocation7 + $0x340] sm:$0xff]   ;;  %v1469_v12 = vpack.c.bf16 %v4492_v2, %v4492_v2 }
 0x34a   :  { %v3759_v4 = vld [vmem:[#allocation7 + $0x2f0] sm:$0xff]   ;;  %v3763_v11 = vld [vmem:[#allocation7 + $0x2f8] sm:$0xff]   ;;  %v3767_v17 = vld [vmem:[#allocation7 + $0x3c0] sm:$0xff]  }
 0x34b   :  { %3389 = vmatpush3.bf16.msra.mxu0 %v3714_v48  ;;  %v3758_v5 = vld [vmem:[#allocation7 + $0x230] sm:$0xff]   ;;  %v3762_v14 = vld [vmem:[#allocation7 + $0x238] sm:$0xff]   ;;  %v3766_v19 = vld [vmem:[#allocation7 + $0x300] sm:$0xff]  }
 0x34c   :  { %3411 = vmatpush3.bf16.msra.mxu1 %v3716_v22  ;;  %3390 = vmatprep.subr.bf16.mxu0 %v3717_v30  ;;  %v3760_v7 = vld [vmem:[#allocation7 + $0x2b0] sm:$0xff]   ;;  %v3764_v1 = vld [vmem:[#allocation7 + $0x2b8] sm:$0xff]   ;;  %v3768_v48 = vld [vmem:[#allocation7 + $0x380] sm:$0xff]   ;;  %v1471_v22 = vpack.c.bf16 %v4495_v18, %v4495_v18 }
 0x34d   :  { %3412 = vmatprep.subr.bf16.mxu1 %v3719_v52  ;;  %v3769_v30 = vld [vmem:[#allocation7 + $0x348] sm:$0xff]   ;;  %v1474_v52 = vpack.c.bf16 %v4499_v56, %v4499_v56  ;;  %v3775_v18 = vld [vmem:[#allocation7 + $0x3d0] sm:$0xff]  }
 0x34e   :  { %v3772_v2 = vld [vmem:[#allocation7 + $0x388] sm:$0xff]   ;;  %v3776_v56 = vld [vmem:[#allocation7 + $0x390] sm:$0xff]  }
 0x34f   :  { %3391 = vmatpush3.bf16.msra.mxu0 %v3718_v15  ;;  %v3771_v15 = vld [vmem:[#allocation7 + $0x3c8] sm:$0xff]  }
 0x350   :  { %3413 = vmatpush3.bf16.msra.mxu1 %v3720_v24  ;;  %3392 = vmatprep.subr.bf16.mxu0 %v3721_v25  ;;  %v1476_v24 = vpack.c.bf16 %v4505_v38, %v4505_v38  ;;  %v3770_v25 = vld [vmem:[#allocation7 + $0x308] sm:$0xff]   ;;  %v3780_v38 = vld [vmem:[#allocation7 + $0x398] sm:$0xff]  }
 0x351   :  { %3414 = vmatprep.subr.bf16.mxu1 %v3723_v26  ;;  %v3773_v26 = vld [vmem:[#allocation7 + $0x350] sm:$0xff]  }
 0x353   :  { %3393 = vmatpush3.bf16.msra.mxu0 %v3722_v27  ;;  %v3774_v27 = vld [vmem:[#allocation7 + $0x310] sm:$0xff]  }
 0x354   :  { %3415 = vmatpush3.bf16.msra.mxu1 %v3724_v28  ;;  %3394 = vmatprep.subr.bf16.mxu0 %v3725_v29  ;;  %v3777_v28 = vld [vmem:[#allocation7 + $0x358] sm:$0xff]  }
 0x355   :  { %3416 = vmatprep.subr.bf16.mxu1 %v3727_v0  ;;  %v3779_v29 = vld [vmem:[#allocation7 + $0x3d8] sm:$0xff]  }
 0x356   :  { %v3778_v0 = vld [vmem:[#allocation7 + $0x318] sm:$0xff]  }
 0x357   :  { %3395 = vmatpush3.bf16.msra.mxu0 %v3726_v31  ;;  %v3781_v31 = vld [vmem:[#allocation7 + $0x360] sm:$0xff]  }
 0x358   :  { %3417 = vmatpush3.bf16.msra.mxu1 %v3728_v32  ;;  %3396 = vmatprep.subr.bf16.mxu0 %v3729_v33  ;;  %v3783_v32 = vld [vmem:[#allocation7 + $0x3e0] sm:$0xff]  }
 0x359   :  { %3418 = vmatprep.subr.bf16.mxu1 %v3731_v34  ;;  %v3782_v33 = vld [vmem:[#allocation7 + $0x320] sm:$0xff]  }
 0x35a   :  { %v3784_v34 = vld [vmem:[#allocation7 + $0x3a0] sm:$0xff]  }
 0x35b   :  { %3397 = vmatpush3.bf16.msra.mxu0 %v3730_v35  ;;  %v3785_v35 = vld [vmem:[#allocation7 + $0x368] sm:$0xff]  }
 0x35c   :  { %3419 = vmatpush3.bf16.msra.mxu1 %v3732_v36  ;;  %3426 = vmatprep.subr.bf16.mxu0 %v3733_v8  ;;  %v3787_v36 = vld [vmem:[#allocation7 + $0x3e8] sm:$0xff]  }
 0x35d   :  { %3448 = vmatprep.subr.bf16.mxu1 %v3735_v37  ;;  %v3786_v8 = vld [vmem:[#allocation7 + $0x328] sm:$0xff]  }
 0x35e   :  { %2621 = vmatmul.mubr.bf16.vlgmr.msra.gmra.mrb[52].mxu0 %v1465_v20  ;;  %v3788_v37 = vld [vmem:[#allocation7 + $0x3a8] sm:$0xff]   ;;  %v3791_v20 = vld [vmem:[#allocation7 + $0x3f0] sm:$0xff]  }
 0x35f   :  { %2661 = vmatmul.mubr.bf16.vlgmr.msra.gmra.mrb[28].mxu1 %v1467_v41  ;;  %3427 = vmatpush3.bf16.msra.mxu0 %v3734_v39  ;;  %v3789_v39 = vld [vmem:[#allocation7 + $0x370] sm:$0xff]  }
 0x360   :  { %2700 = vmatprep.mubr.bf16.mxu0 %v1470_v59  ;;  %3449 = vmatpush3.bf16.msra.mxu1 %v3736_v40  ;;  %v3790_v40 = vld [vmem:[#allocation7 + $0x330] sm:$0xff]   ;;  %v3795_v59 = vld [vmem:[#allocation7 + $0x3f8] sm:$0xff]  }
 0x361   :  { %2740 = vmatprep.mubr.bf16.mxu1 %v1472_v23  ;;  %3428 = vmatprep.subr.bf16.mxu0 %v3737_v42  ;;  %v3792_v41 = vld [vmem:[#allocation7 + $0x3b0] sm:$0xff]   ;;  %v3793_v42 = vld [vmem:[#allocation7 + $0x378] sm:$0xff]  }
 0x362   :  { %3450 = vmatprep.subr.bf16.mxu1 %v3739_v43  ;;  %v3794_v43 = vld [vmem:[#allocation7 + $0x338] sm:$0xff]  }
 0x363   :  { %3429 = vmatpush3.bf16.msra.mxu0 %v3738_v44  ;;  %v3796_v23 = vld [vmem:[#allocation7 + $0x3b8] sm:$0xff]   ;;  %v1473_v44 = vpack.c.bf16 %v4502_v13, %v4502_v13 }
 0x364   :  { %3451 = vmatpush3.bf16.msra.mxu1 %v3740_v45  ;;  %3430 = vmatprep.subr.bf16.mxu0 %v3741_v46  ;;  %v1475_v45 = vpack.c.bf16 %v4510_v10, %v4510_v10 }
 0x365   :  { %3452 = vmatprep.subr.bf16.mxu1 %v3743_v47  ;;  %v3053_v47 = vld [vmem:[#allocation8] ss:$0 sm:$0xff] }
 0x367   :  { %3431 = vmatpush3.bf16.msra.mxu0 %v3742_v49 }
 0x368   :  { %3453 = vmatpush3.bf16.msra.mxu1 %v3744_v50  ;;  %3432 = vmatprep.subr.bf16.mxu0 %v3745_v51 }
 0x369   :  { %3454 = vmatprep.subr.bf16.mxu1 %v3747_v6 }
 0x36b   :  { %3433 = vmatpush3.bf16.msra.mxu0 %v3746_v53 }
 0x36c   :  { %3455 = vmatpush3.bf16.msra.mxu1 %v3748_v21  ;;  %3434 = vmatprep.subr.bf16.mxu0 %v3749_v54 }
 0x36d   :  { %3456 = vmatprep.subr.bf16.mxu1 %v3751_v55 }
 0x36f   :  { %3435 = vmatpush3.bf16.msra.mxu0 %v3750_v57 }
 0x370   :  { %3457 = vmatpush3.bf16.msra.mxu1 %v3752_v58  ;;  %3436 = vmatprep.subr.bf16.mxu0 %v3753_v60 }
 0x371   :  { %3458 = vmatprep.subr.bf16.mxu1 %v3755_v61 }
 0x373   :  { %3437 = vmatpush3.bf16.msra.mxu0 %v3754_v62 }
 0x374   :  { %3459 = vmatpush3.bf16.msra.mxu1 %v3756_v63  ;;  %3438 = vmatprep.subr.bf16.mxu0 %v3757_v3 }
 0x375   :  { %3460 = vmatprep.subr.bf16.mxu1 %v3759_v4 }
 0x377   :  { %3439 = vmatpush3.bf16.msra.mxu0 %v3758_v5 }
 0x378   :  { %3461 = vmatpush3.bf16.msra.mxu1 %v3760_v7  ;;  %3440 = vmatprep.subr.bf16.mxu0 %v3761_v9 }
 0x379   :  { %3462 = vmatprep.subr.bf16.mxu1 %v3763_v11 }
 0x37b   :  { %3441 = vmatpush3.bf16.msra.mxu0 %v3762_v14 }
 0x37c   :  { %3463 = vmatpush3.bf16.msra.mxu1 %v3764_v1  ;;  %3470 = vmatprep.subr.bf16.mxu0 %v3765_v16 }
 0x37d   :  { %3492 = vmatprep.subr.bf16.mxu1 %v3767_v17 }
 0x37e   :  { %2701 = vmatmul.mubr.bf16.vlgmr.msra.gmra.mrb[56].mxu0 %v1469_v12 }
 0x37f   :  { %2741 = vmatmul.mubr.bf16.vlgmr.msra.gmra.mrb[32].mxu1 %v1471_v22  ;;  %3471 = vmatpush3.bf16.msra.mxu0 %v3766_v19 }
 0x380   :  { %2780 = vmatprep.mubr.bf16.mxu0 %v1474_v52  ;;  %3493 = vmatpush3.bf16.msra.mxu1 %v3768_v48 }
 0x381   :  { %2820 = vmatprep.mubr.bf16.mxu1 %v1476_v24  ;;  %3472 = vmatprep.subr.bf16.mxu0 %v3769_v30 }
 0x382   :  { %3494 = vmatprep.subr.bf16.mxu1 %v3771_v15 }
 0x383   :  { %3473 = vmatpush3.bf16.msra.mxu0 %v3770_v25 }
 0x384   :  { %3495 = vmatpush3.bf16.msra.mxu1 %v3772_v2  ;;  %3474 = vmatprep.subr.bf16.mxu0 %v3773_v26 }
 0x385   :  { %3496 = vmatprep.subr.bf16.mxu1 %v3775_v18 }
 0x387   :  { %3475 = vmatpush3.bf16.msra.mxu0 %v3774_v27 }
 0x388   :  { %3497 = vmatpush3.bf16.msra.mxu1 %v3776_v56  ;;  %3476 = vmatprep.subr.bf16.mxu0 %v3777_v28 }
 0x389   :  { %3498 = vmatprep.subr.bf16.mxu1 %v3779_v29 }
 0x38b   :  { %3477 = vmatpush3.bf16.msra.mxu0 %v3778_v0 }
 0x38c   :  { %3499 = vmatpush3.bf16.msra.mxu1 %v3780_v38  ;;  %3478 = vmatprep.subr.bf16.mxu0 %v3781_v31 }
 0x38d   :  { %3500 = vmatprep.subr.bf16.mxu1 %v3783_v32 }
 0x38f   :  { %3479 = vmatpush3.bf16.msra.mxu0 %v3782_v33 }
 0x390   :  { %3501 = vmatpush3.bf16.msra.mxu1 %v3784_v34  ;;  %3480 = vmatprep.subr.bf16.mxu0 %v3785_v35 }
 0x391   :  { %3502 = vmatprep.subr.bf16.mxu1 %v3787_v36 }
 0x393   :  { %3481 = vmatpush3.bf16.msra.mxu0 %v3786_v8 }
 0x394   :  { %3503 = vmatpush3.bf16.msra.mxu1 %v3788_v37  ;;  %3482 = vmatprep.subr.bf16.mxu0 %v3789_v39 }
 0x395   :  { %3504 = vmatprep.subr.bf16.mxu1 %v3791_v20 }
 0x397   :  { %3483 = vmatpush3.bf16.msra.mxu0 %v3790_v40 }
 0x398   :  { %3505 = vmatpush3.bf16.msra.mxu1 %v3792_v41  ;;  %3484 = vmatprep.subr.bf16.mxu0 %v3793_v42 }
 0x399   :  { %3506 = vmatprep.subr.bf16.mxu1 %v3795_v59 }
 0x39b   :  { %3485 = vmatpush3.bf16.msra.mxu0 %v3794_v43 }
 0x39c   :  { %3507 = vmatpush3.bf16.msra.mxu1 %v3796_v23 }
 0x39e   :  { %2781 = vmatmul.mubr.bf16.vlgmr.msra.gmra.mrb[60].mxu0 %v1473_v44 }
 0x39f   :  { %2821 = vmatmul.mubr.bf16.vlgmr.msra.gmra.mrb[36].mxu1 %v1475_v45 }
 0x411   :  { %v3354_v46 = vpop.f32.mrb[48].mxu0 }
 0x412   :  { %v3355_v49 = vpop.f32.mrb[49].mxu0  ;;  %v3376_v50 = vpop.f32.mrb[24].mxu1 }
 0x413   :  { %v3356_v51 = vadd.f32 %v3355_v49, %v3354_v46  ;;  %v3357_v6 = vpop.f32.mrb[50].mxu0  ;;  %v3377_v53 = vpop.f32.mrb[25].mxu1 }
 0x414   :  { %v3378_v21 = vadd.f32 %v3377_v53, %v3376_v50  ;;  %v3358_v54 = vpop.f32.mrb[51].mxu0  ;;  %v3379_v55 = vpop.f32.mrb[26].mxu1 }
 0x415   :  { %v2543_v57 = vadd.f32 %v3356_v51, %v3053_v47  ;;  %v3380_v58 = vpop.f32.mrb[27].mxu1 }
 0x417   :  { %v2583_v60 = vadd.f32 %v3378_v21, %v2543_v57 }
 0x431   :  { %v3398_v61 = vpop.f32.mrb[52].mxu0 }
 0x432   :  { %v3399_v13 = vpop.f32.mrb[53].mxu0  ;;  %v3420_v62 = vpop.f32.mrb[28].mxu1 }
 0x433   :  { %v3400_v63 = vadd.f32 %v3399_v13, %v3398_v61  ;;  %v3401_v10 = vpop.f32.mrb[54].mxu0  ;;  %v3421_v3 = vpop.f32.mrb[29].mxu1 }
 0x434   :  { %v3422_v4 = vadd.f32 %v3421_v3, %v3420_v62  ;;  %v3402_v5 = vpop.f32.mrb[55].mxu0  ;;  %v3423_v7 = vpop.f32.mrb[30].mxu1 }
 0x435   :  { %v2623_v9 = vadd.f32 %v3400_v63, %v2583_v60  ;;  %v3424_v11 = vpop.f32.mrb[31].mxu1 }
 0x437   :  { %v2663_v14 = vadd.f32 %v3422_v4, %v2623_v9 }
 0x451   :  { %v3442_v1 = vpop.f32.mrb[56].mxu0 }
 0x452   :  { %v3443_v16 = vpop.f32.mrb[57].mxu0  ;;  %v3464_v17 = vpop.f32.mrb[32].mxu1 }
 0x453   :  { %v3444_v19 = vadd.f32 %v3443_v16, %v3442_v1  ;;  %v3445_v12 = vpop.f32.mrb[58].mxu0  ;;  %v3465_v48 = vpop.f32.mrb[33].mxu1 }
 0x454   :  { %v3466_v22 = vadd.f32 %v3465_v48, %v3464_v17  ;;  %v3446_v30 = vpop.f32.mrb[59].mxu0  ;;  %v3467_v52 = vpop.f32.mrb[34].mxu1 }
 0x455   :  { %v2703_v15 = vadd.f32 %v3444_v19, %v2663_v14  ;;  %v3468_v24 = vpop.f32.mrb[35].mxu1 }
 0x457   :  { %v2743_v25 = vadd.f32 %v3466_v22, %v2703_v15 }
 0x471   :  { %v3486_v2 = vpop.f32.mrb[60].mxu0 }
 0x472   :  { %v3487_v26 = vpop.f32.mrb[61].mxu0  ;;  %v3508_v18 = vpop.f32.mrb[36].mxu1 }
 0x473   :  { %v3488_v27 = vadd.f32 %v3487_v26, %v3486_v2  ;;  %v3489_v56 = vpop.f32.mrb[62].mxu0  ;;  %v3509_v28 = vpop.f32.mrb[37].mxu1 }
 0x474   :  { %v3510_v29 = vadd.f32 %v3509_v28, %v3508_v18  ;;  %v3490_v0 = vpop.f32.mrb[63].mxu0  ;;  %v3511_v38 = vpop.f32.mrb[38].mxu1 }
 0x475   :  { %v2783_v31 = vadd.f32 %v3488_v27, %v2743_v25  ;;  %v3512_v32 = vpop.f32.mrb[39].mxu1 }
 0x477   :  { %v2823_v33 = vadd.f32 %v3510_v29, %v2783_v31 }
 0x479   :  { %2828 = vst [vmem:[#allocation10] sm:$0x3] %v2823_v33 }
 0x47a   :  { %3896 = shalt.err (!%p3893_p8)
}
 0x47b   :  { %s3897_s8 = scalar_lea.hbm %s4551_s7, 32 }
 0x47c   :  { %p3898_p9 = scmp.ne.s32.totalorder %s4551_s7, %s3897_s8  ;;  %p3901_p10 = scmp.lt.u32.totalorder %s3897_s8, %s4551_s7 }
 0x47e   :  { %p3903_p11 = pnand %p3901_p10, %p3898_p9 }
 0x480   :  { %3906 = shalt.err (!%p3903_p11)
}
 0x481   :  { %2838 = dma.vmem_to_hbm [thread:$0]  %s2836_s29, 32, %s4551_s7, [#allocation4]  }
 0x482   :  { %3913 = dma.done.wait [#allocation4], 32  }
 0x483   :  { %3914 = vsyncadd [#allocation4], 4294967264 }
 0x484   :  { %2842 = vsyncpa [#allocation3], 1 }
 0x485   :  { %2843 = vsyncpa [#allocation6], 1 }
 0x486   :  { %2844 = vsyncpa [#allocation9], 1 }
 0x487   :  { %2845 = vsyncpa [#allocation4], 1 }

</bundles_post_ra>
